<compile_context>
chip_gen: v7x
topology: tpu7x:2x2x1
jax: 0.10.0
libtpu: 0.0.40
codegen_flags: <defaults>
</compile_context>

<pallas_src>
import math

import jax
import jax.numpy as jnp
from jax.experimental import pallas as pl
from jax.experimental.pallas import tpu as pltpu

_LANE = 128  # TPU lane width


# ----------------------------------------------------------------------------
# Kernel
# ----------------------------------------------------------------------------
def vae_forward_kernel(
    x_ref,                     # (tb, D) input tile, compute dtype (bf16/f32)
    we_ref, be_ref,            # encoder Linear(input_dim -> H), W stored (in, out)
    wh_ref, bh_ref,            # fused [mu | logvar] head, padded to lat_pad cols
    whd_ref, bhd_ref,          # folded decoder: Whd = Wmu @ Wd, bhd = bmu @ Wd + bd
    wo_ref, bo_ref,            # _dec Linear(H_dec -> input_dim)
    latT_ref,                  # (2*z_dim, tb) transposed [mu ; logvar], f32
    recon_ref,                 # (tb, D) reconstruction, compute dtype
):
    f32 = jnp.float32
    cdt = x_ref.dtype          # MXU operand dtype (bf16 default, f32 optional)

    x = x_ref[...]

    # ---- encoder: Linear + ReLU (bias/activation in f32) ----
    h = jnp.dot(x, we_ref[...], preferred_element_type=f32) + be_ref[...]
    h = jnp.maximum(h, 0.0)
    hc = h.astype(cdt)

    # ---- fused latent heads: cols [0:Z)=mu, [Z:2Z)=logvar, rest exact zeros ----
    lat = jnp.dot(hc, wh_ref[...], preferred_element_type=f32) + bh_ref[...]

    # ---- folded decoder: hd = relu(mu @ Wd + bd) == relu(h @ Whd + bhd) ----
    hd = jnp.dot(hc, whd_ref[...], preferred_element_type=f32) + bhd_ref[...]
    hd = jnp.maximum(hd, 0.0)

    # ---- output layer + sigmoid (_dec_act, binary=True) ----
    logits = jnp.dot(hd.astype(cdt), wo_ref[...],
                     preferred_element_type=f32) + bo_ref[...]
    recon = 0.5 * (jnp.tanh(0.5 * logits) + 1.0)   # sigmoid via EUP tanh

    # ---- lane-dense latent store: transpose (XLU) then drop the zero pad ----
    lat_t = jnp.transpose(lat)                     # (lat_pad, tb), tile-aligned
    latT_ref[...] = lat_t[: latT_ref.shape[0], :]  # keep rows [0:2Z)
    recon_ref[...] = recon.astype(recon_ref.dtype)


# ----------------------------------------------------------------------------
# Wrapper helpers
# ----------------------------------------------------------------------------
def _pick_batch_tile(B, *, min_steps=2, cap=2048):
    """Batch tile: multiple of 128 (lane width; also satisfies bf16 (16,128)
    sublane packing), capped at 2048 so double-buffered x/recon/latT tiles stay
    far below the scoped-VMEM default on all generations, and small enough that
    the grid has >= min_steps steps (feeds both v7x TensorCores and overlaps
    input/output DMA with compute; extra steps cost only ~0.35us each on
    single-TC v5e/v6e)."""
    Bp = pl.cdiv(B, _LANE) * _LANE
    tb = min(cap, Bp)
    while tb > _LANE and pl.cdiv(Bp, tb) < min_steps:
        tb //= 2
    return max(_LANE, (tb // _LANE) * _LANE)


def pack_params(p, z_dim, compute_dtype=jnp.bfloat16):
    """Fuse mu/logvar heads (lane-padded), fold the decoder through z = mu,
    cast MXU operands to compute_dtype (biases stay f32)."""
    H = p["We"].shape[1]
    lat_pad = max(_LANE, pl.cdiv(2 * z_dim, _LANE) * _LANE)

    Wh = jnp.zeros((H, lat_pad), jnp.float32)
    Wh = Wh.at[:, :z_dim].set(p["Wmu"]).at[:, z_dim:2 * z_dim].set(p["Wlv"])
    bh = jnp.zeros((1, lat_pad), jnp.float32)
    bh = bh.at[:, :z_dim].set(p["bmu"]).at[:, z_dim:2 * z_dim].set(p["blv"])

    # Eval-mode reparameterize gives z = mu, so the decoder's first Linear can
    # be folded:  relu(mu @ Wd + bd) == relu(h @ (Wmu @ Wd) + (bmu @ Wd + bd)).
    Whd = p["Wmu"] @ p["Wd"]                 # (H_enc, H_dec), folded in f32
    bhd = p["bmu"] @ p["Wd"] + p["bd"]       # (1, H_dec)

    cdt = compute_dtype
    return dict(
        We=p["We"].astype(cdt), be=p["be"],
        Wh=Wh.astype(cdt), bh=bh,
        Whd=Whd.astype(cdt), bhd=bhd,
        Wo=p["Wo"].astype(cdt), bo=p["bo"],
        z_dim=z_dim, lat_pad=lat_pad,
    )


def vae_forward(x, packed, *, batch_tile=None, min_grid_steps=2):
    """VAE forward pass via one pipelined pallas_call.

    x: (B, input_dim) float32.  packed: output of pack_params().
    Returns (z, recon, mu, logvar); z is aliased to mu (eval mode); recon is in
    the compute dtype (bf16 by default) to keep the HBM stream narrow.
    """
    B, D = x.shape
    Z = packed["z_dim"]
    LP = packed["lat_pad"]
    cdt = packed["We"].dtype
    H_enc = packed["We"].shape[1]
    H_dec = packed["Whd"].shape[1]

    tb = batch_tile if batch_tile is not None else _pick_batch_tile(
        B, min_steps=min_grid_steps)
    Bp = pl.cdiv(B, tb) * tb
    grid = (Bp // tb,)

    # Cast in the wrapper so the x DMA stream is already narrow; pad ragged B
    # (e.g. last dataset batch) instead of creating one giant VMEM tile.
    xc = x.astype(cdt)
    if Bp != B:
        xc = jnp.pad(xc, ((0, Bp - B), (0, 0)))

    def full(a):
        # Constant block index -> weight/bias stays VMEM-resident across grid.
        return pl.BlockSpec(a.shape, lambda i: (0,) * a.ndim)

    in_specs = [
        pl.BlockSpec((tb, D), lambda i: (i, 0)),       # x (batch-tiled)
        full(packed["We"]), full(packed["be"]),
        full(packed["Wh"]), full(packed["bh"]),
        full(packed["Whd"]), full(packed["bhd"]),
        full(packed["Wo"]), full(packed["bo"]),
    ]
    out_specs = [
        pl.BlockSpec((2 * Z, tb), lambda i: (0, i)),   # latT: lane dim = batch
        pl.BlockSpec((tb, D), lambda i: (i, 0)),       # recon
    ]
    out_shape = [
        jax.ShapeDtypeStruct((2 * Z, Bp), jnp.float32),   # [mu ; logvar]^T
        jax.ShapeDtypeStruct((Bp, D), cdt),               # recon (narrow stream)
    ]

    itemsize = jnp.dtype(cdt).itemsize
    weight_bytes = sum(int(v.size) * jnp.dtype(v.dtype).itemsize
                       for k, v in packed.items()
                       if k not in ("z_dim", "lat_pad"))
    cost = pl.CostEstimate(
        flops=2 * Bp * (D * H_enc + H_enc * LP + H_enc * H_dec + H_dec * D),
        transcendentals=Bp * D,
        bytes_accessed=Bp * D * itemsize * 2 + 2 * Z * Bp * 4 + weight_bytes,
    )

    fn = pl.pallas_call(
        vae_forward_kernel,
        grid_spec=pltpu.PrefetchScalarGridSpec(
            num_scalar_prefetch=0,
            grid=grid,
            in_specs=in_specs,
            out_specs=out_specs,
        ),
        out_shape=out_shape,
        compiler_params=pltpu.CompilerParams(
            dimension_semantics=("parallel",),   # batch axis shards on v7x
        ),
        cost_estimate=cost,
    )
    latT, recon = fn(
        xc,
        packed["We"], packed["be"],
        packed["Wh"], packed["bh"],
        packed["Whd"], packed["bhd"],
        packed["Wo"], packed["bo"],
    )
    latT = latT[:, :B]
    recon = recon[:B]
    mu = latT[:Z, :].T
    logvar = latT[Z:2 * Z, :].T
    z = mu                      # eval-mode reparameterize: z = mu (no extra writeback)
    return z, recon, mu, logvar


# ----------------------------------------------------------------------------
# Params / reference
# ----------------------------------------------------------------------------
def init_params(key, input_dim, hidden, z_dim):
    """PyTorch-Linear-style init: U(-1/sqrt(fan_in), 1/sqrt(fan_in)).
    Weights stored (in_features, out_features); biases (1, out_features)."""
    def linear(k, fan_in, fan_out):
        kw, kb = jax.random.split(k)
        bound = 1.0 / math.sqrt(fan_in)
        W = jax.random.uniform(kw, (fan_in, fan_out), jnp.float32, -bound, bound)
        b = jax.random.uniform(kb, (1, fan_out), jnp.float32, -bound, bound)
        return W, b

    keys = jax.random.split(key, 5)
    We, be = linear(keys[0], input_dim, hidden)     # encoder[0]
    Wmu, bmu = linear(keys[1], hidden, z_dim)       # _enc_mu
    Wlv, blv = linear(keys[2], hidden, z_dim)       # _enc_log_sigma
    Wd, bd = linear(keys[3], z_dim, hidden)         # decoder[0]
    Wo, bo = linear(keys[4], hidden, input_dim)     # _dec
    return dict(We=We, be=be, Wmu=Wmu, bmu=bmu, Wlv=Wlv, blv=blv,
                Wd=Wd, bd=bd, Wo=Wo, bo=bo)


def vae_forward_ref(x, p):
    """Pure-JAX reference matching the PyTorch module (eval mode)."""
    h = jax.nn.relu(x @ p["We"] + p["be"])
    mu = h @ p["Wmu"] + p["bmu"]
    logvar = h @ p["Wlv"] + p["blv"]
    z = mu
    hd = jax.nn.relu(z @ p["Wd"] + p["bd"])
    recon = jax.nn.sigmoid(hd @ p["Wo"] + p["bo"])
    return z, recon, mu, logvar


# ----------------------------------------------------------------------------
# Demo / test
# ----------------------------------------------------------------------------
if __name__ == "__main__":
    # Small MLP-VAE shapes: batch=256 (tiled by 128 -> 2 pipelined/parallel
    # grid steps), input_dim=256, encodeLayer=[128], decodeLayer=[128], z_dim=16.
    B, INPUT_DIM, HIDDEN, Z_DIM = 256, 256, 128, 16

    key = jax.random.PRNGKey(0)
    kx, kp = jax.random.split(key)
    x = jax.random.uniform(kx, (B, INPUT_DIM), jnp.float32, 0.0, 1.0)
    params = init_params(kp, INPUT_DIM, HIDDEN, Z_DIM)

    ref = vae_forward_ref(x, params)

    def check(out, atol, rtol):
        for got, want in zip(out, ref):
            got = got.astype(jnp.float32)
            assert jnp.allclose(got, want, atol=atol, rtol=rtol), (
                got.dtype, float(jnp.max(jnp.abs(got - want))))

    # Strict-precision f32 path (decoder fold changes float association only).
    packed_f32 = pack_params(params, Z_DIM, compute_dtype=jnp.float32)
    out_f32 = vae_forward(x, packed_f32)
    jax.block_until_ready(out_f32)
    check(out_f32, atol=5e-5, rtol=5e-5)

    # Default bf16 streaming path (~2x less HBM traffic; relaxed tolerance).
    packed_bf16 = pack_params(params, Z_DIM)          # compute_dtype=bf16
    out_bf16 = vae_forward(x, packed_bf16)
    jax.block_until_ready(out_bf16)
    check(out_bf16, atol=5e-2, rtol=5e-2)

    print("KERNEL_OK")
</pallas_src>

<mosaic_0001>
module attributes {stable_mosaic.version = 11 : i64} {
  func.func @vae_forward_kernel(%arg0: i32, %arg1: memref<128x256xf32, #tpu.memory_space<vmem>>, %arg2: memref<256x128xf32, #tpu.memory_space<vmem>>, %arg3: memref<1x128xf32, #tpu.memory_space<vmem>>, %arg4: memref<128x128xf32, #tpu.memory_space<vmem>>, %arg5: memref<1x128xf32, #tpu.memory_space<vmem>>, %arg6: memref<128x128xf32, #tpu.memory_space<vmem>>, %arg7: memref<1x128xf32, #tpu.memory_space<vmem>>, %arg8: memref<128x256xf32, #tpu.memory_space<vmem>>, %arg9: memref<1x256xf32, #tpu.memory_space<vmem>>, %arg10: memref<32x128xf32, #tpu.memory_space<vmem>>, %arg11: memref<128x256xf32, #tpu.memory_space<vmem>>) attributes {dimension_semantics = [#tpu.dimension_semantics<parallel>], iteration_bounds = array<i64: 2>, scalar_prefetch = 0 : i64, scratch_operands = 0 : i64, tpu.core_type = #tpu.core_type<tc>, window_params = [{transform_indices = @transform_0, window_bounds = array<i64: 128, 256>}, {pipeline_mode = #tpu.pipeline_mode<synchronous>, transform_indices = @transform_1, window_bounds = array<i64: 256, 128>}, {pipeline_mode = #tpu.pipeline_mode<synchronous>, transform_indices = @transform_2, window_bounds = array<i64: 1, 128>}, {pipeline_mode = #tpu.pipeline_mode<synchronous>, transform_indices = @transform_3, window_bounds = array<i64: 128, 128>}, {pipeline_mode = #tpu.pipeline_mode<synchronous>, transform_indices = @transform_4, window_bounds = array<i64: 1, 128>}, {pipeline_mode = #tpu.pipeline_mode<synchronous>, transform_indices = @transform_5, window_bounds = array<i64: 128, 128>}, {pipeline_mode = #tpu.pipeline_mode<synchronous>, transform_indices = @transform_6, window_bounds = array<i64: 1, 128>}, {pipeline_mode = #tpu.pipeline_mode<synchronous>, transform_indices = @transform_7, window_bounds = array<i64: 128, 256>}, {pipeline_mode = #tpu.pipeline_mode<synchronous>, transform_indices = @transform_8, window_bounds = array<i64: 1, 256>}, {transform_indices = @transform_9, window_bounds = array<i64: 32, 128>}, {transform_indices = @transform_10, window_bounds = array<i64: 128, 256>}]} {
    %c0 = arith.constant 0 : index
    %c0_0 = arith.constant 0 : index
    %0 = vector.load %arg1[%c0, %c0_0] : memref<128x256xf32, #tpu.memory_space<vmem>>, vector<128x256xf32>
    %c0_1 = arith.constant 0 : index
    %c0_2 = arith.constant 0 : index
    %1 = vector.load %arg2[%c0_1, %c0_2] : memref<256x128xf32, #tpu.memory_space<vmem>>, vector<256x128xf32>
    %cst = arith.constant dense<0.000000e+00> : vector<128x128xf32>
    %2 = tpu.matmul %0, %1, %cst {dimension_numbers = #tpu.dot_dimension_numbers<[1], [0], [0], [1], [0, 0, 1, 1], [], []>} : vector<128x256xf32>, vector<256x128xf32>, vector<128x128xf32> -> vector<128x128xf32>
    %c0_3 = arith.constant 0 : index
    %c0_4 = arith.constant 0 : index
    %3 = vector.load %arg3[%c0_3, %c0_4] : memref<1x128xf32, #tpu.memory_space<vmem>>, vector<1x128xf32>
    %4 = vector.broadcast %3 : vector<1x128xf32> to vector<128x128xf32>
    %5 = arith.addf %2, %4 : vector<128x128xf32>
    %cst_5 = arith.constant 0.000000e+00 : f32
    %6 = vector.broadcast %cst_5 : f32 to vector<128x128xf32>
    %7 = arith.maximumf %5, %6 : vector<128x128xf32>
    %c0_6 = arith.constant 0 : index
    %c0_7 = arith.constant 0 : index
    %8 = vector.load %arg4[%c0_6, %c0_7] : memref<128x128xf32, #tpu.memory_space<vmem>>, vector<128x128xf32>
    %cst_8 = arith.constant dense<0.000000e+00> : vector<128x128xf32>
    %9 = tpu.matmul %7, %8, %cst_8 {dimension_numbers = #tpu.dot_dimension_numbers<[1], [0], [0], [1], [0, 0, 1, 1], [], []>} : vector<128x128xf32>, vector<128x128xf32>, vector<128x128xf32> -> vector<128x128xf32>
    %c0_9 = arith.constant 0 : index
    %c0_10 = arith.constant 0 : index
    %10 = vector.load %arg5[%c0_9, %c0_10] : memref<1x128xf32, #tpu.memory_space<vmem>>, vector<1x128xf32>
    %11 = vector.broadcast %10 : vector<1x128xf32> to vector<128x128xf32>
    %12 = arith.addf %9, %11 : vector<128x128xf32>
    %c0_11 = arith.constant 0 : index
    %c0_12 = arith.constant 0 : index
    %13 = vector.load %arg6[%c0_11, %c0_12] : memref<128x128xf32, #tpu.memory_space<vmem>>, vector<128x128xf32>
    %cst_13 = arith.constant dense<0.000000e+00> : vector<128x128xf32>
    %14 = tpu.matmul %7, %13, %cst_13 {dimension_numbers = #tpu.dot_dimension_numbers<[1], [0], [0], [1], [0, 0, 1, 1], [], []>} : vector<128x128xf32>, vector<128x128xf32>, vector<128x128xf32> -> vector<128x128xf32>
    %c0_14 = arith.constant 0 : index
    %c0_15 = arith.constant 0 : index
    %15 = vector.load %arg7[%c0_14, %c0_15] : memref<1x128xf32, #tpu.memory_space<vmem>>, vector<1x128xf32>
    %16 = vector.broadcast %15 : vector<1x128xf32> to vector<128x128xf32>
    %17 = arith.addf %14, %16 : vector<128x128xf32>
    %cst_16 = arith.constant 0.000000e+00 : f32
    %18 = vector.broadcast %cst_16 : f32 to vector<128x128xf32>
    %19 = arith.maximumf %17, %18 : vector<128x128xf32>
    %c0_17 = arith.constant 0 : index
    %c0_18 = arith.constant 0 : index
    %20 = vector.load %arg8[%c0_17, %c0_18] : memref<128x256xf32, #tpu.memory_space<vmem>>, vector<128x256xf32>
    %cst_19 = arith.constant dense<0.000000e+00> : vector<128x256xf32>
    %21 = tpu.matmul %19, %20, %cst_19 {dimension_numbers = #tpu.dot_dimension_numbers<[1], [0], [0], [1], [0, 0, 1, 1], [], []>} : vector<128x128xf32>, vector<128x256xf32>, vector<128x256xf32> -> vector<128x256xf32>
    %c0_20 = arith.constant 0 : index
    %c0_21 = arith.constant 0 : index
    %22 = vector.load %arg9[%c0_20, %c0_21] : memref<1x256xf32, #tpu.memory_space<vmem>>, vector<1x256xf32>
    %23 = vector.broadcast %22 : vector<1x256xf32> to vector<128x256xf32>
    %24 = arith.addf %21, %23 : vector<128x256xf32>
    %cst_22 = arith.constant 5.000000e-01 : f32
    %25 = vector.broadcast %cst_22 : f32 to vector<128x256xf32>
    %26 = arith.mulf %25, %24 : vector<128x256xf32>
    %27 = math.tanh %26 : vector<128x256xf32>
    %cst_23 = arith.constant 1.000000e+00 : f32
    %28 = vector.broadcast %cst_23 : f32 to vector<128x256xf32>
    %29 = arith.addf %27, %28 : vector<128x256xf32>
    %cst_24 = arith.constant 5.000000e-01 : f32
    %30 = vector.broadcast %cst_24 : f32 to vector<128x256xf32>
    %31 = arith.mulf %30, %29 : vector<128x256xf32>
    %32 = tpu.transpose %12, [1, 0] : vector<128x128xf32> -> vector<128x128xf32>
    %33 = vector.extract_strided_slice %32 {offsets = [0, 0], sizes = [32, 128], strides = [1, 1]} : vector<128x128xf32> to vector<32x128xf32>
    %c0_25 = arith.constant 0 : index
    %c0_26 = arith.constant 0 : index
    %34 = vector.load %arg10[%c0_25, %c0_26] : memref<32x128xf32, #tpu.memory_space<vmem>>, vector<32x128xf32>
    tpu.vector_store %arg10[%c0_25, %c0_26], %33 {strides = array<i32>} : memref<32x128xf32, #tpu.memory_space<vmem>>, vector<32x128xf32>,
    %c0_27 = arith.constant 0 : index
    %c0_28 = arith.constant 0 : index
    %35 = vector.load %arg11[%c0_27, %c0_28] : memref<128x256xf32, #tpu.memory_space<vmem>>, vector<128x256xf32>
    tpu.vector_store %arg11[%c0_27, %c0_28], %31 {strides = array<i32>} : memref<128x256xf32, #tpu.memory_space<vmem>>, vector<128x256xf32>,
    return
  }
  func.func @transform_0(%arg0: i32) -> (i32, i32) {
    %c0_i32 = arith.constant 0 : i32
    %c0_i32_0 = arith.constant 0 : i32
    return %arg0, %c0_i32 : i32, i32
  }
  func.func @transform_1(%arg0: i32) -> (i32, i32) {
    %c0_i32 = arith.constant 0 : i32
    %c0_i32_0 = arith.constant 0 : i32
    %c0_i32_1 = arith.constant 0 : i32
    return %c0_i32, %c0_i32_0 : i32, i32
  }
  func.func @transform_2(%arg0: i32) -> (i32, i32) {
    %c0_i32 = arith.constant 0 : i32
    %c0_i32_0 = arith.constant 0 : i32
    %c0_i32_1 = arith.constant 0 : i32
    return %c0_i32, %c0_i32_0 : i32, i32
  }
  func.func @transform_3(%arg0: i32) -> (i32, i32) {
    %c0_i32 = arith.constant 0 : i32
    %c0_i32_0 = arith.constant 0 : i32
    %c0_i32_1 = arith.constant 0 : i32
    return %c0_i32, %c0_i32_0 : i32, i32
  }
  func.func @transform_4(%arg0: i32) -> (i32, i32) {
    %c0_i32 = arith.constant 0 : i32
    %c0_i32_0 = arith.constant 0 : i32
    %c0_i32_1 = arith.constant 0 : i32
    return %c0_i32, %c0_i32_0 : i32, i32
  }
  func.func @transform_5(%arg0: i32) -> (i32, i32) {
    %c0_i32 = arith.constant 0 : i32
    %c0_i32_0 = arith.constant 0 : i32
    %c0_i32_1 = arith.constant 0 : i32
    return %c0_i32, %c0_i32_0 : i32, i32
  }
  func.func @transform_6(%arg0: i32) -> (i32, i32) {
    %c0_i32 = arith.constant 0 : i32
    %c0_i32_0 = arith.constant 0 : i32
    %c0_i32_1 = arith.constant 0 : i32
    return %c0_i32, %c0_i32_0 : i32, i32
  }
  func.func @transform_7(%arg0: i32) -> (i32, i32) {
    %c0_i32 = arith.constant 0 : i32
    %c0_i32_0 = arith.constant 0 : i32
    %c0_i32_1 = arith.constant 0 : i32
    return %c0_i32, %c0_i32_0 : i32, i32
  }
  func.func @transform_8(%arg0: i32) -> (i32, i32) {
    %c0_i32 = arith.constant 0 : i32
    %c0_i32_0 = arith.constant 0 : i32
    %c0_i32_1 = arith.constant 0 : i32
    return %c0_i32, %c0_i32_0 : i32, i32
  }
  func.func @transform_9(%arg0: i32) -> (i32, i32) {
    %c0_i32 = arith.constant 0 : i32
    %c0_i32_0 = arith.constant 0 : i32
    return %c0_i32, %arg0 : i32, i32
  }
  func.func @transform_10(%arg0: i32) -> (i32, i32) {
    %c0_i32 = arith.constant 0 : i32
    %c0_i32_0 = arith.constant 0 : i32
    return %arg0, %c0_i32 : i32, i32
  }
}

</mosaic_0001>

<bundles_post_ra>
// kernel: tpu_custom_call.1
= control target key start
LH: loop header
LB: loop body
LE: loop exit
PB: predicated region body
PF: predicated region fallthrough
CT: control target
= control target key end

     0   :  { %s3105_s0 = inlined_call_operand.hbm [shape: f32[256,256], index: 0, kind: input, shape index: {}]   ;;  %s3106_s1 = inlined_call_operand.hbm [shape: f32[256,128], index: 1, kind: input, shape index: {}]   ;;  %s3107_s2 = inlined_call_operand.vmem [shape: f32[1,128], index: 2, kind: input, shape index: {}]   ;;  %s3108_s3 = inlined_call_operand.hbm [shape: f32[128,128], index: 3, kind: input, shape index: {}]   ;;  %s3109_s4 = inlined_call_operand.vmem [shape: f32[1,128], index: 4, kind: input, shape index: {}]   ;;  %s3110_s5 = inlined_call_operand.hbm [shape: f32[128,128], index: 5, kind: input, shape index: {}]   ;;  %s3111_s6 = inlined_call_operand.vmem [shape: f32[1,128], index: 6, kind: input, shape index: {}]   ;;  %s3112_s7 = inlined_call_operand.hbm [shape: f32[128,256], index: 7, kind: input, shape index: {}]   ;;  %s3113_s8 = inlined_call_operand.vmem [shape: f32[1,256], index: 8, kind: input, shape index: {}]   ;;  %s3114_s9 = inlined_call_operand.hbm [shape: f32[32,256], index: 9, kind: output, shape index: {0}]   ;;  %s3115_s10 = inlined_call_operand.hbm [shape: f32[256,256], index: 10, kind: output, shape index: {1}]  }
   0x1   :  { %3122 = sst [smem:[#allocation21_spill]] %s3113_s8 }
   0x2   :  { %3123 = sst [smem:[#allocation22_spill]] %s3115_s10 }
   0x3   :  { %16 = vsyncpa [#allocation3], 0 }
   0x4   :  { %18 = vsyncpa [#allocation3 + $0x1], 0 }
   0x5   :  { %19 = vsyncpa [#allocation6], 0 }
   0x6   :  { %20 = vsyncpa [#allocation9], 0 }
   0x7   :  { %21 = vsyncpa [#allocation4], 0 }
   0x8   :  { %23 = vsyncpa [#allocation4 + $0x1], 0 }
   0x9   :  { %24 = vsyncpa [#allocation13], 0 }
   0xa   :  { %26 = vsyncpa [#allocation13 + $0x1], 0  ;;  %s2533_s13 = smov 0   ;;  %s2535_s14 = smov 0  }
   0xb   :  { %s2537_s15 = smov 0   ;;  %s2539_s16 = smov 0  }
   0xc LB: > { %3124 = sst [smem:[#allocation19_spill]] %s2448_s13  ;;  %s2554_s17 = sadd.s32 4294967295, %s2460_s16   ;;  %s2460_s16 = sphi %s2539_s16, %s3150_s16   ;;  %s2456_s15 = sphi %s2537_s15, %s3149_s15   ;;  %s2452_s14 = sphi %s2535_s14, %s3148_s14   ;;  %s2448_s13 = sphi %s2533_s13, %s3147_s13  }
   0xd   : > { %s1613_s18 = sadd.s32 4294967294, %s2460_s16   ;;  %p52_p0 = scmp.ne.s32.totalorder %s2452_s14, %s2448_s13 }
   0xe   : > { %p3116_p1 = scmp.eq.s32.totalorder %s2554_s17, 0  ;;  %p250_p3 = scmp.eq.s32.totalorder %s1613_s18, 1 }
   0xf   : > { %p1614_p5 = scmp.ge.s32.totalorder %s2460_s16, 1  ;;  %p283_p7 = scmp.lt.s32.totalorder %s2460_s16, 3 }
  0x10   : > { %p2563_p4 = por %p3116_p1, %p52_p0  ;;  %p2568_p6 = por %p250_p3, %p52_p0 }
  0x11   : > { %p2573_p8 = pnand %p1614_p5, %p283_p7  ;;  %s2462_s22 = smov [#allocation5]  }
  0x12   : > { %s3125_s19 = scalar_select %p2563_p4, 1, 0 }
  0x13   : > { %s3126_s20 = scalar_select %p2568_p6, 1, 0 }
  0x14   : > { %s3128_s21 = scalar_select %p2573_p8, 1, 0 }
  0x15   : > { %3127 = sst [smem:[#allocation20_spill]] %s3126_s20  ;;  %s295_s23 = sshll.u32 %s2462_s22, 4  ;;  %s2577_s23 = int_to_ptr.vmem [resolvable:$true] %s295_s23 }
  0x16   : > { %p2069_p9 = pneg %p2573_p8  ;;  %s2463_s25 = smov [#allocation8]  }
  0x17   : > { %s327_s26 = sshll.u32 %s2463_s25, 4  ;;  %s2464_s27 = smov [#allocation7]   ;;  %s2588_s26 = int_to_ptr.vmem [resolvable:$true] %s327_s26 }
  0x18   : > { %p2584_p11 = pnand %p2069_p9, %p3116_p1  ;;  %s2590_s28 = sshll.u32 %s2464_s27, 4  ;;  %s312_s28 = int_to_ptr.vmem [resolvable:$true] %s2590_s28 }
  0x19   : > { %s2212_s11 = scalar_lea.hbm %s3106_s1, 4096 }
  0x1a   : > { %p2213_p12 = scmp.ne.s32.totalorder %s3106_s1, %s2212_s11  ;;  %p2600_p13 = pneg %p2584_p11 }
  0x1b   : > { %p2219_p5 = scmp.lt.u32.totalorder %s2212_s11, %s3106_s1 }
  0x1c   : > { %p2215_p0 = pnand %p2600_p13, %p2213_p12 }
  0x1e   : > { %p2216_p3 = pneg %p2215_p0 }
  0x20   : > { %p2221_p7 = pnand %p2219_p5, %p2216_p3 }
  0x22   : > { %2224 = shalt.err (!%p2221_p7)
}
  0x23   : > { %s2225_s29 = scalar_lea.vmem %s2577_s23, 4096  ;;  %p2233_p2 = scmp.lt.s32.totalorder %s2577_s23, %s2577_s23 }
  0x24   : > { %p2226_p9 = scmp.ne.s32.totalorder %s2577_s23, %s2225_s29  ;;  %p2234_p6 = scmp.lt.s32.totalorder %s2225_s29, %s2225_s29 }
  0x26   : > { %p2228_p10 = pnand %p2226_p9, %p2600_p13  ;;  %p2235_p12 = por %p2234_p6, %p2233_p2 }
  0x28   : > { %p2229_p1 = pneg %p2228_p10 }
  0x2a   : > { %p2236_p0 = pnand %p2235_p12, %p2229_p1 }
  0x2c   : > { %2239 = shalt.err (!%p2236_p0)
}
  0x2d   : > { %s2465_s30 = smov 128   ;;  %s2466_s11 = smov 8  }
  0x2e   : > { %2072 = dma.hbm_to_vmem [thread:$0]  (!%p2584_p11), %s3106_s1, 4096, %s2577_s23, [#allocation6], %s2465_s30, %s2465_s30, %s2466_s11  }
  0x2f   : > { %s2240_s29 = scalar_lea.hbm %s3110_s5, 2048 }
  0x30   : > { %p2241_p1 = scmp.ne.s32.totalorder %s3110_s5, %s2240_s29  ;;  %p2247_p10 = scmp.lt.u32.totalorder %s2240_s29, %s3110_s5 }
  0x32   : > { %p2243_p2 = pnand %p2241_p1, %p2600_p13 }
  0x34   : > { %p2244_p6 = pneg %p2243_p2 }
  0x36   : > { %p2249_p3 = pnand %p2247_p10, %p2244_p6 }
  0x38   : > { %2252 = shalt.err (!%p2249_p3)
}
  0x39   : > { %s2253_s23 = scalar_lea.vmem %s2588_s26, 2048  ;;  %p2261_p12 = scmp.lt.s32.totalorder %s2588_s26, %s2588_s26 }
  0x3a   : > { %p2254_p5 = scmp.ne.s32.totalorder %s2588_s26, %s2253_s23  ;;  %p2262_p0 = scmp.lt.s32.totalorder %s2253_s23, %s2253_s23 }
  0x3c   : > { %p2256_p7 = pnand %p2254_p5, %p2600_p13  ;;  %p2263_p1 = por %p2262_p0, %p2261_p12 }
  0x3e   : > { %p2257_p9 = pneg %p2256_p7 }
  0x40   : > { %p2264_p2 = pnand %p2263_p1, %p2257_p9 }
  0x42   : > { %2267 = shalt.err (!%p2264_p2)
}
  0x43   : > { %2078 = dma.hbm_to_vmem [thread:$0]  (!%p2584_p11), %s3110_s5, 2048, %s2588_s26, [#allocation9], %s2465_s30, %s2465_s30, %s2466_s11  }
  0x44   : > { %s2268_s12 = scalar_lea.hbm %s3108_s3, 2048 }
  0x45   : > { %p2269_p6 = scmp.ne.s32.totalorder %s3108_s3, %s2268_s12  ;;  %p2275_p5 = scmp.lt.u32.totalorder %s2268_s12, %s3108_s3 }
  0x47   : > { %p2271_p10 = pnand %p2269_p6, %p2600_p13 }
  0x49   : > { %p2272_p3 = pneg %p2271_p10 }
  0x4b   : > { %p2277_p7 = pnand %p2275_p5, %p2272_p3 }
  0x4d   : > { %2280 = shalt.err (!%p2277_p7)
}
  0x4e   : > { %s2281_s23 = scalar_lea.vmem %s312_s28, 2048  ;;  %p2289_p1 = scmp.lt.s32.totalorder %s312_s28, %s312_s28 }
  0x4f   : > { %p2282_p9 = scmp.ne.s32.totalorder %s312_s28, %s2281_s23  ;;  %p2290_p2 = scmp.lt.s32.totalorder %s2281_s23, %s2281_s23 }
  0x51   : > { %p2284_p12 = pnand %p2282_p9, %p2600_p13  ;;  %p2291_p4 = por %p2290_p2, %p2289_p1 }
  0x53   : > { %p2285_p0 = pneg %p2284_p12 }
  0x55   : > { %p2292_p8 = pnand %p2291_p4, %p2285_p0 }
  0x57   : > { %2295 = shalt.err (!%p2292_p8)
}
  0x58   : > { %2075 = dma.hbm_to_vmem [thread:$0]  (!%p2584_p11), %s3108_s3, 2048, %s312_s28, [#allocation6], %s2465_s30, %s2465_s30, %s2466_s11  }
  0x59   : > { %s2467_s10 = smov [#allocation10]   ;;  %s2296_s18 = scalar_lea.hbm %s3112_s7, 4096 }
  0x5a   : > { %s343_s13 = sshll.u32 %s2467_s10, 4  ;;  %p2297_p4 = scmp.ne.s32.totalorder %s3112_s7, %s2296_s18  ;;  %s344_s13 = int_to_ptr.vmem [resolvable:$true] %s343_s13 }
  0x5b   : > { %p2303_p10 = scmp.lt.u32.totalorder %s2296_s18, %s3112_s7 }
  0x5c   : > { %p2299_p8 = pnand %p2297_p4, %p2600_p13 }
  0x5e   : > { %p2300_p6 = pneg %p2299_p8 }
  0x60   : > { %p2305_p3 = pnand %p2303_p10, %p2300_p6 }
  0x62   : > { %2308 = shalt.err (!%p2305_p3)
}
  0x63   : > { %s2309_s28 = scalar_lea.vmem %s344_s13, 4096  ;;  %p2317_p12 = scmp.lt.s32.totalorder %s344_s13, %s344_s13 }
  0x64   : > { %p2310_p5 = scmp.ne.s32.totalorder %s344_s13, %s2309_s28  ;;  %p2318_p0 = scmp.lt.s32.totalorder %s2309_s28, %s2309_s28 }
  0x66   : > { %p2312_p7 = pnand %p2310_p5, %p2600_p13  ;;  %p2319_p1 = por %p2318_p0, %p2317_p12 }
  0x68   : > { %p2313_p9 = pneg %p2312_p7 }
  0x6a   : > { %p2320_p2 = pnand %p2319_p1, %p2313_p9 }
  0x6c   : > { %2323 = shalt.err (!%p2320_p2)
}
  0x6d   : > { %s2468_s30 = smov 256   ;;  %s2469_s22 = smov 16  }
  0x6e   : > { %2081 = dma.hbm_to_vmem [thread:$0]  (!%p2584_p11), %s3112_s7, 4096, %s344_s13, [#allocation9], %s2468_s30, %s2468_s30, %s2469_s22  }
  0x6f   : > { %s2694_s8 = sadd.s32 1, %s2460_s16   ;;  %s39_s20 = sadd.s32 1, %s2456_s15 }
  0x70   : > { %s36_s10 = ssub.s32 %s2460_s16, %s2694_s8  ;;  %p46_p4 = scmp.ne.s32.totalorder %s2456_s15, %s2452_s14 }
  0x71   : > { %p37_p13 = scmp.eq.s32.totalorder %s36_s10, 0  ;;  %p47_p8 = scmp.eq.s32.totalorder %s2460_s16, 0 }
  0x72   : > { %p3131_p10 = scmp.eq.s32.totalorder %s2554_s17, 1  ;;  %p2097_p5 = scmp.lt.s32.totalorder %s2460_s16, 2 }
  0x73   : > { %s2703_s12 = scalar_select %p37_p13, %s2456_s15, %s39_s20  }
  0x74   : > { %p48_p6 = por %p47_p8, %p46_p4  ;;  %p2707_p3 = por %p3131_p10, %p46_p4 }
  0x75   : > { %s360_s18 = sand.u32 1, %s2456_s15   ;;  %s1644_s13 = sshll.u32 %s2460_s16, 12 }
  0x76   : > { %s1620_s25 = sshll.u32 %s360_s18, 8  ;;  %s2717_s23 = scalar_lea.hbm %s3105_s0, %s1644_s13 }
  0x77   : > { %s364_s28 = scalar_lea.vmem [#allocation2], %s1620_s25  ;;  %p2721_p11 = pnand %p2097_p5, %p48_p6 }
  0x78   : > { %s372_s11 = sshll.u32 %s364_s28, 4  ;;  %s2725_s10 = scalar_lea.sflag [#allocation3], %s360_s18  ;;  %s2719_s11 = int_to_ptr.vmem [resolvable:$true] %s372_s11 }
  0x79   : > { %s2324_s20 = scalar_lea.hbm %s2717_s23, 4096  ;;  %p2326_p9 = pneg %p2721_p11 }
  0x7a   : > { %p2325_p7 = scmp.ne.s32.totalorder %s2717_s23, %s2324_s20  ;;  %s2329_s27 = scalar_lea.hbm %s3105_s0, 8192 }
  0x7b   : > { %p2330_p1 = scmp.lt.u32.totalorder %s2717_s23, %s3105_s0  ;;  %p2331_p2 = scmp.lt.u32.totalorder %s2329_s27, %s2324_s20 }
  0x7c   : > { %p2327_p12 = pnand %p2326_p9, %p2325_p7  ;;  %p2333_p4 = scmp.lt.u32.totalorder %s2324_s20, %s2717_s23 }
  0x7d   : > { %p2332_p13 = por %p2331_p2, %p2330_p1 }
  0x7e   : > { %p2328_p0 = pneg %p2327_p12 }
  0x7f   : > { %p2334_p8 = por %p2333_p4, %p2332_p13 }
  0x81   : > { %p2335_p6 = pnand %p2334_p8, %p2328_p0 }
  0x83   : > { %2338 = shalt.err (!%p2335_p6)
}
  0x84   : > { %s2339_s18 = scalar_lea.vmem %s2719_s11, 4096  ;;  %s2470_s25 = smov [#allocation2]  }
  0x85   : > { %p2340_p10 = scmp.ne.s32.totalorder %s2719_s11, %s2339_s18  ;;  %s2344_s13 = sshll.u32 %s2470_s25, 4  ;;  %s2345_s13 = int_to_ptr.vmem [resolvable:$false] %s2344_s13 }
  0x86   : > { %s2346_s29 = scalar_lea.vmem %s2345_s13, 8192  ;;  %p2347_p12 = scmp.lt.s32.totalorder %s2719_s11, %s2345_s13 }
  0x87   : > { %p2342_p5 = pnand %p2340_p10, %p2326_p9  ;;  %p2348_p1 = scmp.lt.s32.totalorder %s2346_s29, %s2339_s18 }
  0x89   : > { %p2343_p7 = pneg %p2342_p5  ;;  %p2349_p2 = por %p2348_p1, %p2347_p12 }
  0x8b   : > { %p2350_p13 = pnand %p2349_p2, %p2343_p7 }
  0x8d   : > { %2353 = shalt.err (!%p2350_p13)
}
  0x8e   : > { %2085 = dma.hbm_to_vmem [thread:$0]  (!%p2721_p11), %s2717_s23, 4096, %s2719_s11, %s2725_s10, %s2468_s30, %s2468_s30, %s2469_s22  }
  0x8f   : > { %p3134_p9 = scmp.ne.s32.totalorder %s3128_s21, 0 }
  0x90   : > { %s2759_s20 = sand.u32 (!%p3134_p9), 1, %s2452_s14   ;;  %p3135_p0 = scmp.ne.s32.totalorder (!%p3134_p9), %s3125_s19, 0 }
  0x91   : > { %384 = sbr.rel (%p3134_p9) target bundleno = 986 (0x3da), region = 56  ;;  %s1625_s27 = sshll.u32 (!%p3134_p9), %s2759_s20, 8 }
  0x92   : > { %s387_s28 = scalar_lea.sflag (!%p3134_p9), [#allocation3], %s2759_s20  ;;  %s2765_s26 = scalar_lea.vmem (!%p3134_p9), [#allocation2], %s1625_s27 }
  0x98   : > { %2427 = dma.done.wait (%p3135_p0), %s387_s28, 4096  }
  0x99   : > { %2429 = vsyncadd (%p3135_p0), %s387_s28, 4294963200  ;;  %p3136_p11 = scmp.eq.s32.totalorder %s2554_s17, 0 }
  0x9b   : > { %2431 = dma.done.wait (%p3136_p11), [#allocation6], 6144   ;;  %p3137_p4 = pmov %p3136_p11 }
  0x9d   : > { %2433 = vsyncadd (%p3137_p4), [#allocation6], 4294961152  ;;  %p3138_p8 = pmov %p3137_p4 }
  0x9e   : > { %p3139_p6 = pmov %p3137_p4 }
  0x9f   : > { %2435 = dma.done.wait (%p3138_p8), [#allocation9], 6144  }
  0xa0   : > { %2437 = vsyncadd (%p3139_p6), [#allocation9], 4294961152  ;;  %v498_v0 = vld [vmem:[#allocation5 + $0x80] sm:$0xff]  ;;  %v499_v1 = vld [vmem:[#allocation5 + $0x88] sm:$0xff]  ;;  %s1630_s10 = sshll.u32 %s2759_s20, 5  ;;  %s1637_s13 = sshll.u32 %s2554_s17, 7 }
  0xa1   : > { %v482_v2 = vld [vmem:[#allocation5] sm:$0xff]  ;;  %v1903_v3 = vpack.c.bf16 %v499_v1, %v498_v0  ;;  %v483_v4 = vld [vmem:[#allocation5 + $0x8] sm:$0xff]  ;;  %v500_v5 = vld [vmem:[#allocation5 + $0x90] sm:$0xff]  ;;  %s440_s18 = scalar_lea.vmem [#allocation11], %s1630_s10  ;;  %s1436_s19 = scalar_lea.sflag [#allocation4], %s2759_s20 }
  0xa2   : > { %v501_v6 = vld [vmem:[#allocation5 + $0x98] sm:$0xff]  ;;  %v1905_v7 = vpack.c.bf16 %v483_v4, %v482_v2  ;;  %v484_v9 = vld [vmem:[#allocation5 + $0x10] sm:$0xff]  ;;  %v502_v11 = vld [vmem:[#allocation5 + $0xa0] sm:$0xff]  ;;  %s1453_s25 = sshll.u32 %s440_s18, 4  ;;  %s2472_s30 = smov [#allocation11]   ;;  %s2945_s25 = int_to_ptr.vmem [resolvable:$true] %s1453_s25 }
  0xa3   : > { %v1907_v8 = vpack.c.bf16 %v501_v6, %v500_v5  ;;  %v485_v10 = vld [vmem:[#allocation5 + $0x18] sm:$0xff]  ;;  %1904 = vmatprep.subr.bf16.mxu0 %v1903_v3  ;;  %v503_v12 = vld [vmem:[#allocation5 + $0xa8] sm:$0xff]  ;;  %2031 = vmatprep.subr.bf16.mxu1 %v1903_v3  ;;  %v486_v15 = vld [vmem:[#allocation5 + $0x20] sm:$0xff]  ;;  %s2354_s21 = scalar_lea.vmem %s2945_s25, 512  ;;  %s2358_s22 = sshll.u32 %s2472_s30, 4  ;;  %s2359_s22 = int_to_ptr.vmem [resolvable:$false] %s2358_s22 }
  0xa4   : > { %1906 = vmatpush3.bf16.msra.mxu0 %v1905_v7  ;;  %v1909_v13 = vpack.c.bf16 %v485_v10, %v484_v9  ;;  %2039 = vmatpush3.bf16.msra.mxu1 %v1905_v7  ;;  %v1911_v14 = vpack.c.bf16 %v503_v12, %v502_v11  ;;  %v487_v16 = vld [vmem:[#allocation5 + $0x28] sm:$0xff]  ;;  %v504_v17 = vld [vmem:[#allocation5 + $0xb0] sm:$0xff]  ;;  %v505_v18 = vld [vmem:[#allocation5 + $0xb8] sm:$0xff]  ;;  %p2355_p10 = scmp.ne.s32.totalorder %s2945_s25, %s2354_s21  ;;  %s2360_s23 = scalar_lea.vmem %s2359_s22, 1024 }
  0xa5   : > { %1908 = vmatprep.subr.bf16.mxu0 %v1907_v8  ;;  %2032 = vmatprep.subr.bf16.mxu1 %v1907_v8  ;;  %v1913_v19 = vpack.c.bf16 %v487_v16, %v486_v15  ;;  %v1915_v20 = vpack.c.bf16 %v505_v18, %v504_v17  ;;  %v488_v21 = vld [vmem:[#allocation5 + $0x30] sm:$0xff]  ;;  %v489_v22 = vld [vmem:[#allocation5 + $0x38] sm:$0xff]  ;;  %v506_v23 = vld [vmem:[#allocation5 + $0xc0] sm:$0xff]  ;;  %p2361_p12 = scmp.lt.s32.totalorder %s2945_s25, %s2359_s22  ;;  %p2362_p1 = scmp.lt.s32.totalorder %s2360_s23, %s2354_s21 }
  0xa6   : > { %v507_v24 = vld [vmem:[#allocation5 + $0xc8] sm:$0xff]  ;;  %v1917_v26 = vpack.c.bf16 %v489_v22, %v488_v21  ;;  %v490_v28 = vld [vmem:[#allocation5 + $0x40] sm:$0xff]  ;;  %v508_v31 = vld [vmem:[#allocation5 + $0xd0] sm:$0xff]  ;;  %p2356_p5 = pnand %p2355_p10, %p2707_p3 }
  0xa7   : > { %v451_v25 = vld [vmem:[%s2765_s26 + $0x8] sm:$0xff]  ;;  %v1919_v27 = vpack.c.bf16 %v507_v24, %v506_v23  ;;  %v509_v32 = vld [vmem:[#allocation5 + $0xd8] sm:$0xff]  ;;  %v492_v35 = vld [vmem:[#allocation5 + $0x50] sm:$0xff]  ;;  %p2363_p2 = por %p2362_p1, %p2361_p12 }
  0xa8   : > { %1910 = vmatpush3.bf16.msra.mxu0 %v1909_v13  ;;  %2040 = vmatpush3.bf16.msra.mxu1 %v1909_v13  ;;  %v491_v29 = vld [vmem:[#allocation5 + $0x48] sm:$0xff]  ;;  %v1923_v34 = vpack.c.bf16 %v509_v32, %v508_v31  ;;  %v493_v36 = vld [vmem:[#allocation5 + $0x58] sm:$0xff]  ;;  %v510_v37 = vld [vmem:[#allocation5 + $0xe0] sm:$0xff]  ;;  %p2357_p7 = pneg %p2356_p5 }
  0xa9   : > { %1912 = vmatprep.subr.bf16.mxu0 %v1911_v14  ;;  %2033 = vmatprep.subr.bf16.mxu1 %v1911_v14  ;;  %v467_v30 = vld [vmem:[%s2765_s26 + $0x88] sm:$0xff]  ;;  %v1921_v33 = vpack.c.bf16 %v491_v29, %v490_v28  ;;  %v1925_v39 = vpack.c.bf16 %v493_v36, %v492_v35  ;;  %v494_v41 = vld [vmem:[#allocation5 + $0x60] sm:$0xff]  ;;  %v512_v43 = vld [vmem:[#allocation5 + $0xf0] sm:$0xff] }
  0xaa   : > { %585 = vmatprep.mubr.f32.mxu0 %v451_v25  ;;  %625 = vmatprep.mubr.f32.mxu1 %v467_v30  ;;  %v511_v38 = vld [vmem:[#allocation5 + $0xe8] sm:$0xff]  ;;  %v513_v44 = vld [vmem:[#allocation5 + $0xf8] sm:$0xff]  ;;  %v496_v47 = vld [vmem:[#allocation5 + $0x70] sm:$0xff]  ;;  %p2364_p13 = pnand %p2363_p2, %p2357_p7 }
  0xab   : > { %v1927_v40 = vpack.c.bf16 %v511_v38, %v510_v37  ;;  %v495_v42 = vld [vmem:[#allocation5 + $0x68] sm:$0xff]  ;;  %v1931_v46 = vpack.c.bf16 %v513_v44, %v512_v43  ;;  %v497_v48 = vld [vmem:[#allocation5 + $0x78] sm:$0xff]  ;;  %v682_v49 = vld [vmem:[#allocation7] sm:$0xff] }
  0xac   : > { %1914 = vmatpush3.bf16.msra.mxu0 %v1913_v19  ;;  %2041 = vmatpush3.bf16.msra.mxu1 %v1913_v19  ;;  %v1929_v45 = vpack.c.bf16 %v495_v42, %v494_v41  ;;  %v683_v50 = vld [vmem:[#allocation7 + $0x8] sm:$0xff]  ;;  %v1933_v51 = vpack.c.bf16 %v497_v48, %v496_v47  ;;  %v684_v53 = vld [vmem:[#allocation7 + $0x10] sm:$0xff]  ;;  %v685_v54 = vld [vmem:[#allocation7 + $0x18] sm:$0xff] }
  0xad   : > { %1916 = vmatprep.subr.bf16.mxu0 %v1915_v20  ;;  %2034 = vmatprep.subr.bf16.mxu1 %v1915_v20  ;;  %v1935_v52 = vpack.c.bf16 %v683_v50, %v682_v49  ;;  %v450_v55 = vld [vmem:[%s2765_s26] sm:$0xff]  ;;  %v453_v57 = vld [vmem:[%s2765_s26 + $0x18] sm:$0xff]  ;;  %v1939_v59 = vpack.c.bf16 %v685_v54, %v684_v53  ;;  %v687_v61 = vld [vmem:[#allocation7 + $0x28] sm:$0xff] }
  0xae   : > { %v466_v56 = vld [vmem:[%s2765_s26 + $0x80] sm:$0xff]  ;;  %v469_v58 = vld [vmem:[%s2765_s26 + $0x98] sm:$0xff]  ;;  %v452_v62 = vld [vmem:[%s2765_s26 + $0x10] sm:$0xff] }
  0xaf   : > { %v686_v60 = vld [vmem:[#allocation7 + $0x20] sm:$0xff]  ;;  %v468_v63 = vld [vmem:[%s2765_s26 + $0x90] sm:$0xff]  ;;  %v455_v0 = vld [vmem:[%s2765_s26 + $0x28] sm:$0xff] }
  0xb0   : > { %1918 = vmatpush3.bf16.msra.mxu0 %v1917_v26  ;;  %2042 = vmatpush3.bf16.msra.mxu1 %v1917_v26  ;;  %v471_v1 = vld [vmem:[%s2765_s26 + $0xa8] sm:$0xff]  ;;  %v1943_v2 = vpack.c.bf16 %v687_v61, %v686_v60  ;;  %v688_v3 = vld [vmem:[#allocation7 + $0x30] sm:$0xff]  ;;  %v689_v4 = vld [vmem:[#allocation7 + $0x38] sm:$0xff] }
  0xb1   : > { %1920 = vmatprep.subr.bf16.mxu0 %v1919_v27  ;;  %2035 = vmatprep.subr.bf16.mxu1 %v1919_v27  ;;  %v454_v5 = vld [vmem:[%s2765_s26 + $0x20] sm:$0xff]  ;;  %v457_v7 = vld [vmem:[%s2765_s26 + $0x38] sm:$0xff]  ;;  %v1947_v9 = vpack.c.bf16 %v689_v4, %v688_v3  ;;  %v691_v11 = vld [vmem:[#allocation7 + $0x48] sm:$0xff] }
  0xb2   : > { %v470_v6 = vld [vmem:[%s2765_s26 + $0xa0] sm:$0xff]  ;;  %v473_v8 = vld [vmem:[%s2765_s26 + $0xb8] sm:$0xff]  ;;  %v456_v12 = vld [vmem:[%s2765_s26 + $0x30] sm:$0xff] }
  0xb3   : > { %v690_v10 = vld [vmem:[#allocation7 + $0x40] sm:$0xff]  ;;  %v472_v13 = vld [vmem:[%s2765_s26 + $0xb0] sm:$0xff]  ;;  %v459_v14 = vld [vmem:[%s2765_s26 + $0x48] sm:$0xff] }
  0xb4   : > { %1922 = vmatpush3.bf16.msra.mxu0 %v1921_v33  ;;  %2043 = vmatpush3.bf16.msra.mxu1 %v1921_v33  ;;  %v475_v15 = vld [vmem:[%s2765_s26 + $0xc8] sm:$0xff]  ;;  %v1951_v16 = vpack.c.bf16 %v691_v11, %v690_v10  ;;  %v458_v17 = vld [vmem:[%s2765_s26 + $0x40] sm:$0xff]  ;;  %v461_v19 = vld [vmem:[%s2765_s26 + $0x58] sm:$0xff] }
  0xb5   : > { %1924 = vmatprep.subr.bf16.mxu0 %v1923_v34  ;;  %2036 = vmatprep.subr.bf16.mxu1 %v1923_v34  ;;  %v474_v18 = vld [vmem:[%s2765_s26 + $0xc0] sm:$0xff]  ;;  %v477_v20 = vld [vmem:[%s2765_s26 + $0xd8] sm:$0xff]  ;;  %v460_v21 = vld [vmem:[%s2765_s26 + $0x50] sm:$0xff] }
  0xb6   : > { %v476_v22 = vld [vmem:[%s2765_s26 + $0xd0] sm:$0xff]  ;;  %v463_v23 = vld [vmem:[%s2765_s26 + $0x68] sm:$0xff]  ;;  %v462_v25 = vld [vmem:[%s2765_s26 + $0x60] sm:$0xff] }
  0xb7   : > { %v479_v24 = vld [vmem:[%s2765_s26 + $0xe8] sm:$0xff]  ;;  %v478_v26 = vld [vmem:[%s2765_s26 + $0xe0] sm:$0xff]  ;;  %v465_v27 = vld [vmem:[%s2765_s26 + $0x78] sm:$0xff] }
  0xb8   : > { %1926 = vmatpush3.bf16.msra.mxu0 %v1925_v39  ;;  %2044 = vmatpush3.bf16.msra.mxu1 %v1925_v39  ;;  %v481_v28 = vld [vmem:[%s2765_s26 + $0xf8] sm:$0xff]  ;;  %v464_v29 = vld [vmem:[%s2765_s26 + $0x70] sm:$0xff]  ;;  %v694_v34 = vld [vmem:[#allocation7 + $0x60] sm:$0xff] }
  0xb9   : > { %1928 = vmatprep.subr.bf16.mxu0 %v1927_v40  ;;  %2037 = vmatprep.subr.bf16.mxu1 %v1927_v40  ;;  %v480_v30 = vld [vmem:[%s2765_s26 + $0xf0] sm:$0xff]  ;;  %v693_v32 = vld [vmem:[#allocation7 + $0x58] sm:$0xff]  ;;  %v695_v35 = vld [vmem:[#allocation7 + $0x68] sm:$0xff]  ;;  %s2950_s26 = scalar_lea.hbm %s3114_s9, %s1637_s13 }
  0xba   : > { %v692_v31 = vld [vmem:[#allocation7 + $0x50] sm:$0xff]  ;;  %v1959_v36 = vpack.c.bf16 %v695_v35, %v694_v34  ;;  %v697_v38 = vld [vmem:[#allocation7 + $0x78] sm:$0xff]  ;;  %v850_v40 = vld [vmem:[#allocation8] sm:$0xff] }
  0xbb   : > { %v1955_v33 = vpack.c.bf16 %v693_v32, %v692_v31  ;;  %v696_v37 = vld [vmem:[#allocation7 + $0x70] sm:$0xff]  ;;  %v851_v41 = vld [vmem:[#allocation8 + $0x8] sm:$0xff] }
  0xbc   : > { %1930 = vmatpush3.bf16.msra.mxu0 %v1929_v45  ;;  %2045 = vmatpush3.bf16.msra.mxu1 %v1929_v45  ;;  %v1963_v39 = vpack.c.bf16 %v697_v38, %v696_v37  ;;  %v1967_v42 = vpack.c.bf16 %v851_v41, %v850_v40  ;;  %v2814_v45 = vld [vmem:[%s3107_s2] ss:$0 sm:$0xff]  ;;  %v860_v38 = vld [vmem:[#allocation8 + $0x50] sm:$0xff] }
  0xbd   : > { %1932 = vmatprep.subr.bf16.mxu0 %v1931_v46  ;;  %2038 = vmatprep.subr.bf16.mxu1 %v1931_v46 }
  0xc0   : > { %1934 = vmatpush3.bf16.msra.mxu0 %v1933_v51  ;;  %2046 = vmatpush3.bf16.msra.mxu1 %v1933_v51 }
  0xc1   : > { %1936 = vmatprep.subr.bf16.mxu1 %v1935_v52 }
  0xc3   : > { %586 = vmatmul.mubr.f32.vlgmr.msra.gmra.mrb[0].mxu0 %v450_v55  ;;  %626 = vmatmul.mubr.f32.vlgmr.msra.gmra.mrb[0].mxu1 %v466_v56 }
  0xc4   : > { %590 = vmatprep.mubr.f32.mxu0 %v453_v57  ;;  %630 = vmatprep.mubr.f32.mxu1 %v469_v58  ;;  %v852_v58 = vld [vmem:[#allocation8 + $0x10] sm:$0xff] }
  0xc5   : > { %1938 = vmatpush3.bf16.msra.mxu1 %v1935_v52 }
  0xc6   : > { %1940 = vmatprep.subr.bf16.mxu1 %v1939_v59 }
  0xc7   : > { %591 = vmatmul.mubr.f32.gmra.mrb[2].mxu0 %v452_v62  ;;  %631 = vmatmul.mubr.f32.gmra.mrb[2].mxu1 %v468_v63 }
  0xc8   : > { %595 = vmatprep.mubr.f32.mxu0 %v455_v0  ;;  %635 = vmatprep.mubr.f32.mxu1 %v471_v1 }
  0xc9   : > { %1942 = vmatpush3.bf16.msra.mxu1 %v1939_v59  ;;  %v853_v59 = vld [vmem:[#allocation8 + $0x18] sm:$0xff] }
  0xca   : > { %1944 = vmatprep.subr.bf16.mxu1 %v1943_v2  ;;  %v1971_v4 = vpack.c.bf16 %v853_v59, %v852_v58 }
  0xcb   : > { %596 = vmatmul.mubr.f32.gmra.mrb[4].mxu0 %v454_v5  ;;  %636 = vmatmul.mubr.f32.gmra.mrb[4].mxu1 %v470_v6  ;;  %v854_v5 = vld [vmem:[#allocation8 + $0x20] sm:$0xff]  ;;  %v855_v6 = vld [vmem:[#allocation8 + $0x28] sm:$0xff] }
  0xcc   : > { %600 = vmatprep.mubr.f32.mxu0 %v457_v7  ;;  %640 = vmatprep.mubr.f32.mxu1 %v473_v8 }
  0xcd   : > { %1946 = vmatpush3.bf16.msra.mxu1 %v1943_v2 }
  0xce   : > { %1948 = vmatprep.subr.bf16.mxu1 %v1947_v9 }
  0xcf   : > { %601 = vmatmul.mubr.f32.gmra.mrb[6].mxu0 %v456_v12  ;;  %641 = vmatmul.mubr.f32.gmra.mrb[6].mxu1 %v472_v13 }
  0xd0   : > { %605 = vmatprep.mubr.f32.mxu0 %v459_v14  ;;  %645 = vmatprep.mubr.f32.mxu1 %v475_v15  ;;  %v1975_v15 = vpack.c.bf16 %v855_v6, %v854_v5  ;;  %v864_v5 = vld [vmem:[#allocation8 + $0x70] sm:$0xff]  ;;  %v865_v6 = vld [vmem:[#allocation8 + $0x78] sm:$0xff] }
  0xd1   : > { %1950 = vmatpush3.bf16.msra.mxu1 %v1947_v9 }
  0xd2   : > { %1952 = vmatprep.subr.bf16.mxu1 %v1951_v16 }
  0xd3   : > { %606 = vmatmul.mubr.f32.gmra.mrb[8].mxu0 %v458_v17  ;;  %646 = vmatmul.mubr.f32.gmra.mrb[8].mxu1 %v474_v18  ;;  %v857_v17 = vld [vmem:[#allocation8 + $0x38] sm:$0xff] }
  0xd4   : > { %610 = vmatprep.mubr.f32.mxu0 %v461_v19  ;;  %650 = vmatprep.mubr.f32.mxu1 %v477_v20 }
  0xd5   : > { %1954 = vmatpush3.bf16.msra.mxu1 %v1951_v16  ;;  %v856_v16 = vld [vmem:[#allocation8 + $0x30] sm:$0xff] }
  0xd6   : > { %1956 = vmatprep.subr.bf16.mxu1 %v1955_v33 }
  0xd7   : > { %611 = vmatmul.mubr.f32.gmra.mrb[10].mxu0 %v460_v21  ;;  %651 = vmatmul.mubr.f32.gmra.mrb[10].mxu1 %v476_v22 }
  0xd8   : > { %615 = vmatprep.mubr.f32.mxu0 %v463_v23  ;;  %655 = vmatprep.mubr.f32.mxu1 %v479_v24 }
  0xd9   : > { %1958 = vmatpush3.bf16.msra.mxu1 %v1955_v33 }
  0xda   : > { %1960 = vmatprep.subr.bf16.mxu1 %v1959_v36 }
  0xdb   : > { %616 = vmatmul.mubr.f32.gmra.mrb[12].mxu0 %v462_v25  ;;  %656 = vmatmul.mubr.f32.gmra.mrb[12].mxu1 %v478_v26  ;;  %v1979_v26 = vpack.c.bf16 %v857_v17, %v856_v16 }
  0xdc   : > { %620 = vmatprep.mubr.f32.mxu0 %v465_v27  ;;  %660 = vmatprep.mubr.f32.mxu1 %v481_v28  ;;  %v858_v27 = vld [vmem:[#allocation8 + $0x40] sm:$0xff]  ;;  %v859_v28 = vld [vmem:[#allocation8 + $0x48] sm:$0xff] }
  0xdd   : > { %1962 = vmatpush3.bf16.msra.mxu1 %v1959_v36  ;;  %v1983_v37 = vpack.c.bf16 %v859_v28, %v858_v27  ;;  %v1040_v27 = vld [vmem:[#allocation10 + $0x30] sm:$0xff] }
  0xde   : > { %1964 = vmatprep.subr.bf16.mxu1 %v1963_v39 }
  0xdf   : > { %621 = vmatmul.mubr.f32.gmra.mrb[14].mxu0 %v464_v29  ;;  %661 = vmatmul.mubr.f32.gmra.mrb[14].mxu1 %v480_v30 }
  0xe1   : > { %1966 = vmatpush3.bf16.msra.mxu1 %v1963_v39  ;;  %v861_v39 = vld [vmem:[#allocation8 + $0x58] sm:$0xff] }
  0xe2   : > { %1968 = vmatprep.subr.bf16.mxu1 %v1967_v42 }
 0x196   : > { %v1679_v43 = vpop.f32.mrb[0].mxu0  ;;  %v1703_v44 = vpop.f32.mrb[0].mxu1 }
 0x197   : > { %v1680_v46 = vpop.f32.mrb[1].mxu0  ;;  %v1704_v47 = vpop.f32.mrb[1].mxu1 }
 0x198   : > { %v1681_v48 = vadd.f32 %v1680_v46, %v1679_v43  ;;  %v2816_v49 = vadd.f32 %v1704_v47, %v1703_v44 }
 0x19a   : > { %v2819_v50 = vadd.f32 %v1681_v48, %v2814_v45  ;;  %v1682_v51 = vpop.f32.mrb[2].mxu0  ;;  %v1706_v52 = vpop.f32.mrb[2].mxu1 }
 0x19b   : > { %v1683_v53 = vpop.f32.mrb[3].mxu0  ;;  %v1707_v54 = vpop.f32.mrb[3].mxu1 }
 0x19c   : > { %v666_v55 = vmax.f32 %v2819_v50, 0.0  ;;  %v1684_v56 = vadd.f32 %v1683_v53, %v1682_v51  ;;  %v2822_v57 = vadd.f32 %v1707_v54, %v1706_v52  ;;  %v1987_v51 = vpack.c.bf16 %v861_v39, %v860_v38  ;;  %v862_v52 = vld [vmem:[#allocation8 + $0x60] sm:$0xff]  ;;  %v863_v53 = vld [vmem:[#allocation8 + $0x68] sm:$0xff]  ;;  %v1037_v50 = vld [vmem:[#allocation10 + $0x18] sm:$0xff] }
 0x19d   : > { %v1046_v38 = vld [vmem:[#allocation10 + $0x60] sm:$0xff]  ;;  %v1048_v39 = vld [vmem:[#allocation10 + $0x70] sm:$0xff] }
 0x19e   : > { %v2825_v60 = vadd.f32 %v1684_v56, %v2814_v45  ;;  %v1685_v61 = vpop.f32.mrb[4].mxu0  ;;  %1823 = vmatprep.mubr.f32.mxu1 %v666_v55  ;;  %v1709_v62 = vpop.f32.mrb[4].mxu1 }
 0x19f   : > { %v1686_v63 = vpop.f32.mrb[5].mxu0  ;;  %v1710_v0 = vpop.f32.mrb[5].mxu1 }
 0x1a0   : > { %v667_v1 = vmax.f32 %v2825_v60, 0.0  ;;  %v1687_v2 = vadd.f32 %v1686_v63, %v1685_v61  ;;  %v2830_v3 = vadd.f32 %v1710_v0, %v1709_v62  ;;  %v1034_v60 = vld [vmem:[#allocation10] sm:$0xff] }
 0x1a2   : > { %v2833_v7 = vadd.f32 %v1687_v2, %v2814_v45  ;;  %v1688_v8 = vpop.f32.mrb[6].mxu0  ;;  %1824 = vmatmul.mubr.f32.vlgmr.msra.gmra.mrb[16].mxu1 %v667_v1  ;;  %v1712_v9 = vpop.f32.mrb[6].mxu1  ;;  %v1991_v2 = vpack.c.bf16 %v863_v53, %v862_v52  ;;  %v1054_v53 = vld [vmem:[#allocation10 + $0xa0] sm:$0xff] }
 0x1a3   : > { %v1689_v10 = vpop.f32.mrb[7].mxu0  ;;  %1970 = vmatpush3.bf16.msra.mxu1 %v1967_v42  ;;  %v1713_v11 = vpop.f32.mrb[7].mxu1 }
 0x1a4   : > { %v668_v12 = vmax.f32 %v2833_v7, 0.0  ;;  %v1690_v13 = vadd.f32 %v1689_v10, %v1688_v8  ;;  %1972 = vmatprep.subr.bf16.mxu1 %v1971_v4  ;;  %v2838_v14 = vadd.f32 %v1713_v11, %v1712_v9  ;;  %v633_v9 = vadd.f32 %v2822_v57, %v2814_v45 }
 0x1a5   : > { %v1995_v11 = vpack.c.bf16 %v865_v6, %v864_v5  ;;  %v1062_v6 = vld [vmem:[#allocation10 + $0xe0] sm:$0xff] }
 0x1a6   : > { %v2841_v18 = vadd.f32 %v1690_v13, %v2814_v45  ;;  %v1691_v19 = vpop.f32.mrb[8].mxu0  ;;  %1826 = vmatprep.mubr.f32.mxu1 %v668_v12  ;;  %v1715_v20 = vpop.f32.mrb[8].mxu1  ;;  %v643_v16 = vadd.f32 %v2838_v14, %v2814_v45 }
 0x1a7   : > { %v1692_v21 = vpop.f32.mrb[9].mxu0  ;;  %1974 = vmatpush3.bf16.msra.mxu1 %v1971_v4  ;;  %v1716_v22 = vpop.f32.mrb[9].mxu1  ;;  %v628_v4 = vadd.f32 %v2816_v49, %v2814_v45  ;;  %v675_v49 = vmax.f32 %v633_v9, 0.0 }
 0x1a8   : > { %v669_v23 = vmax.f32 %v2841_v18, 0.0  ;;  %v1693_v24 = vadd.f32 %v1692_v21, %v1691_v19  ;;  %1976 = vmatprep.subr.bf16.mxu1 %v1975_v15  ;;  %v2846_v25 = vadd.f32 %v1716_v22, %v1715_v20  ;;  %v677_v57 = vmax.f32 %v643_v16, 0.0  ;;  %v1041_v18 = vld [vmem:[#allocation10 + $0x38] sm:$0xff] }
 0x1a9   : > { %v674_v13 = vmax.f32 %v628_v4, 0.0  ;;  %v1065_v4 = vld [vmem:[#allocation10 + $0xf8] sm:$0xff] }
 0x1aa   : > { %v2849_v29 = vadd.f32 %v1693_v24, %v2814_v45  ;;  %v1694_v30 = vpop.f32.mrb[10].mxu0  ;;  %1827 = vmatmul.mubr.f32.gmra.mrb[18].mxu1 %v669_v23  ;;  %v1718_v31 = vpop.f32.mrb[10].mxu1  ;;  %v648_v19 = vadd.f32 %v2846_v25, %v2814_v45  ;;  %v1038_v25 = vld [vmem:[#allocation10 + $0x20] sm:$0xff] }
 0x1ab   : > { %v1695_v32 = vpop.f32.mrb[11].mxu0  ;;  %1978 = vmatpush3.bf16.msra.mxu1 %v1975_v15  ;;  %v1719_v33 = vpop.f32.mrb[11].mxu1  ;;  %v638_v15 = vadd.f32 %v2830_v3, %v2814_v45  ;;  %v2005_v28 = vpack.c.bf16 %v1040_v27, %v1038_v25 }
 0x1ac   : > { %v670_v34 = vmax.f32 %v2849_v29, 0.0  ;;  %v1696_v35 = vadd.f32 %v1695_v32, %v1694_v30  ;;  %1980 = vmatprep.subr.bf16.mxu1 %v1979_v26  ;;  %v1720_v36 = vadd.f32 %v1719_v33, %v1718_v31  ;;  %v678_v21 = vmax.f32 %v648_v19, 0.0  ;;  %v1043_v29 = vld [vmem:[#allocation10 + $0x48] sm:$0xff]  ;;  %v1045_v30 = vld [vmem:[#allocation10 + $0x58] sm:$0xff]  ;;  %v1042_v32 = vld [vmem:[#allocation10 + $0x40] sm:$0xff] }
 0x1ad   : > { %v676_v17 = vmax.f32 %v638_v15, 0.0  ;;  %v2007_v31 = vpack.c.bf16 %v1045_v30, %v1043_v29  ;;  %v1044_v33 = vld [vmem:[#allocation10 + $0x50] sm:$0xff]  ;;  %v2905_v30 = vld [vmem:[%s3111_s6] ss:$0 sm:$0xff] }
 0x1ae   : > { %v2855_v40 = vadd.f32 %v1696_v35, %v2814_v45  ;;  %v1697_v41 = vpop.f32.mrb[12].mxu0  ;;  %1829 = vmatprep.mubr.f32.mxu1 %v670_v34  ;;  %v1721_v42 = vpop.f32.mrb[12].mxu1  ;;  %v653_v20 = vadd.f32 %v1720_v36, %v2814_v45  ;;  %v1047_v35 = vld [vmem:[#allocation10 + $0x68] sm:$0xff]  ;;  %v1049_v36 = vld [vmem:[#allocation10 + $0x78] sm:$0xff] }
 0x1af   : > { %v1698_v43 = vpop.f32.mrb[13].mxu0  ;;  %1982 = vmatpush3.bf16.msra.mxu1 %v1979_v26  ;;  %v1722_v44 = vpop.f32.mrb[13].mxu1 }
 0x1b0   : > { %v671_v46 = vmax.f32 %v2855_v40, 0.0  ;;  %v1699_v47 = vadd.f32 %v1698_v43, %v1697_v41  ;;  %1984 = vmatprep.subr.bf16.mxu1 %v1983_v37  ;;  %v1723_v48 = vadd.f32 %v1722_v44, %v1721_v42  ;;  %v679_v24 = vmax.f32 %v653_v20, 0.0  ;;  %v1051_v41 = vld [vmem:[#allocation10 + $0x88] sm:$0xff]  ;;  %v1053_v42 = vld [vmem:[#allocation10 + $0x98] sm:$0xff]  ;;  %v1050_v44 = vld [vmem:[#allocation10 + $0x80] sm:$0xff] }
 0x1b1   : > { %v2013_v40 = vpack.c.bf16 %v1048_v39, %v1046_v38  ;;  %v2015_v43 = vpack.c.bf16 %v1053_v42, %v1051_v41 }
 0x1b2   : > { %v618_v54 = vadd.f32 %v1699_v47, %v2814_v45  ;;  %v1700_v56 = vpop.f32.mrb[14].mxu0  ;;  %1830 = vmatmul.mubr.f32.gmra.mrb[20].mxu1 %v671_v46  ;;  %v1724_v58 = vpop.f32.mrb[14].mxu1  ;;  %v658_v3 = vadd.f32 %v1723_v48, %v2814_v45  ;;  %v1055_v48 = vld [vmem:[#allocation10 + $0xa8] sm:$0xff] }
 0x1b3   : > { %v1701_v59 = vpop.f32.mrb[15].mxu0  ;;  %1986 = vmatpush3.bf16.msra.mxu1 %v1983_v37  ;;  %v1725_v61 = vpop.f32.mrb[15].mxu1  ;;  %v2011_v37 = vpack.c.bf16 %v1049_v36, %v1047_v35 }
 0x1b4   : > { %v672_v62 = vmax.f32 %v618_v54, 0.0  ;;  %v1702_v63 = vadd.f32 %v1701_v59, %v1700_v56  ;;  %1988 = vmatprep.subr.bf16.mxu1 %v1987_v51  ;;  %v1726_v0 = vadd.f32 %v1725_v61, %v1724_v58  ;;  %v680_v14 = vmax.f32 %v658_v3, 0.0  ;;  %v1056_v54 = vld [vmem:[#allocation10 + $0xb0] sm:$0xff]  ;;  %v1059_v58 = vld [vmem:[#allocation10 + $0xc8] sm:$0xff]  ;;  %v1061_v59 = vld [vmem:[#allocation10 + $0xd8] sm:$0xff] }
 0x1b5   : > { %v2021_v56 = vpack.c.bf16 %v1056_v54, %v1054_v53  ;;  %v2023_v61 = vpack.c.bf16 %v1061_v59, %v1059_v58 }
 0x1b6   : > { %v623_v8 = vadd.f32 %v1702_v63, %v2814_v45  ;;  %1832 = vmatprep.mubr.f32.mxu1 %v672_v62  ;;  %v663_v22 = vadd.f32 %v1726_v0, %v2814_v45  ;;  %v1035_v45 = vld [vmem:[#allocation10 + $0x8] sm:$0xff]  ;;  %v1060_v63 = vld [vmem:[#allocation10 + $0xd0] sm:$0xff] }
 0x1b7   : > { %1990 = vmatpush3.bf16.msra.mxu1 %v1987_v51  ;;  %v1057_v51 = vld [vmem:[#allocation10 + $0xb8] sm:$0xff] }
 0x1b8   : > { %v673_v10 = vmax.f32 %v623_v8, 0.0  ;;  %1992 = vmatprep.subr.bf16.mxu1 %v1991_v2  ;;  %v681_v26 = vmax.f32 %v663_v22, 0.0  ;;  %v2019_v52 = vpack.c.bf16 %v1057_v51, %v1055_v48  ;;  %v1064_v8 = vld [vmem:[#allocation10 + $0xf0] sm:$0xff] }
 0x1b9   : > { %v2029_v9 = vpack.c.bf16 %v1064_v8, %v1062_v6 }
 0x1ba   : > { %1833 = vmatmul.mubr.f32.gmra.mrb[22].mxu1 %v673_v10 }
 0x1bb   : > { %1835 = vmatprep.mubr.f32.mxu1 %v674_v13  ;;  %1994 = vmatpush3.bf16.msra.mxu1 %v1991_v2  ;;  %v1063_v2 = vld [vmem:[#allocation10 + $0xe8] sm:$0xff] }
 0x1bc   : > { %1996 = vmatprep.subr.bf16.mxu1 %v1995_v11  ;;  %v2027_v5 = vpack.c.bf16 %v1065_v4, %v1063_v2 }
 0x1be   : > { %1836 = vmatmul.mubr.f32.gmra.mrb[24].mxu1 %v675_v49 }
 0x1bf   : > { %1838 = vmatprep.mubr.f32.mxu1 %v676_v17  ;;  %1998 = vmatpush3.bf16.msra.mxu1 %v1995_v11  ;;  %v2889_v11 = vld [vmem:[%s3109_s4] ss:$0 sm:$0xff] }
 0x1c2   : > { %1839 = vmatmul.mubr.f32.gmra.mrb[26].mxu1 %v677_v57 }
 0x1c3   : > { %1841 = vmatprep.mubr.f32.mxu1 %v678_v21 }
 0x1c6   : > { %1842 = vmatmul.mubr.f32.gmra.mrb[28].mxu1 %v679_v24 }
 0x1c7   : > { %1844 = vmatprep.mubr.f32.mxu1 %v680_v14 }
 0x1ca   : > { %1845 = vmatmul.mubr.f32.gmra.mrb[30].mxu1 %v681_v26 }
 0x1cb   : > { %1879 = vmatprep.mubr.f32.mxu1 %v666_v55  ;;  %v1999_v55 = vpack.c.bf16 %v1037_v50, %v1035_v45 }
 0x1cd   : > { %2000 = vmatprep.subr.bf16.mxu0 %v1999_v55 }
 0x1ce   : > { %1880 = vmatmul.mubr.f32.vlgmr.msra.gmra.mrb[32].mxu1 %v667_v1  ;;  %v1036_v1 = vld [vmem:[#allocation10 + $0x10] sm:$0xff] }
 0x1cf   : > { %1882 = vmatprep.mubr.f32.mxu1 %v668_v12  ;;  %v2001_v7 = vpack.c.bf16 %v1036_v1, %v1034_v60  ;;  %v1039_v12 = vld [vmem:[#allocation10 + $0x28] sm:$0xff] }
 0x1d1   : > { %2002 = vmatpush1.bf16.msra.mxu0 %v2001_v7 }
 0x1d2   : > { %1883 = vmatmul.mubr.f32.gmra.mrb[34].mxu1 %v669_v23  ;;  %v2003_v23 = vpack.c.bf16 %v1041_v18, %v1039_v12 }
 0x1d3   : > { %1885 = vmatprep.mubr.f32.mxu1 %v670_v34  ;;  %v2009_v34 = vpack.c.bf16 %v1044_v33, %v1042_v32 }
 0x1d4   : > { %2004 = vmatprep.subr.bf16.mxu0 %v2003_v23 }
 0x1d5   : > { %2006 = vmatpush1.bf16.msra.mxu0 %v2005_v28 }
 0x1d6   : > { %1886 = vmatmul.mubr.f32.gmra.mrb[36].mxu1 %v671_v46  ;;  %2008 = vmatprep.subr.bf16.mxu0 %v2007_v31  ;;  %v1052_v46 = vld [vmem:[#allocation10 + $0x90] sm:$0xff] }
 0x1d7   : > { %1888 = vmatprep.mubr.f32.mxu1 %v672_v62  ;;  %v2017_v47 = vpack.c.bf16 %v1052_v46, %v1050_v44  ;;  %v1058_v62 = vld [vmem:[#allocation10 + $0xc0] sm:$0xff] }
 0x1d8   : > { %v2025_v0 = vpack.c.bf16 %v1060_v63, %v1058_v62 }
 0x1d9   : > { %2010 = vmatpush1.bf16.msra.mxu0 %v2009_v34 }
 0x1da   : > { %1889 = vmatmul.mubr.f32.gmra.mrb[38].mxu1 %v673_v10  ;;  %2012 = vmatprep.subr.bf16.mxu0 %v2011_v37  ;;  %v2471_v10 = vmov 0.0  }
 0x1db   : > { %1891 = vmatprep.mubr.f32.mxu1 %v674_v13  ;;  %1142 = vmatprep.mubr.f32.mxu0 %v2471_v10 }
 0x1dd   : > { %2014 = vmatpush1.bf16.msra.mxu0 %v2013_v40 }
 0x1de   : > { %1892 = vmatmul.mubr.f32.gmra.mrb[40].mxu1 %v675_v49  ;;  %2016 = vmatprep.subr.bf16.mxu0 %v2015_v43 }
 0x1df   : > { %1894 = vmatprep.mubr.f32.mxu1 %v676_v17 }
 0x1e1   : > { %2018 = vmatpush1.bf16.msra.mxu0 %v2017_v47 }
 0x1e2   : > { %1895 = vmatmul.mubr.f32.gmra.mrb[42].mxu1 %v677_v57  ;;  %2020 = vmatprep.subr.bf16.mxu0 %v2019_v52 }
 0x1e3   : > { %1897 = vmatprep.mubr.f32.mxu1 %v678_v21 }
 0x1e5   : > { %2022 = vmatpush1.bf16.msra.mxu0 %v2021_v56 }
 0x1e6   : > { %1898 = vmatmul.mubr.f32.gmra.mrb[44].mxu1 %v679_v24  ;;  %2024 = vmatprep.subr.bf16.mxu0 %v2023_v61 }
 0x1e7   : > { %1900 = vmatprep.mubr.f32.mxu1 %v680_v14 }
 0x1e9   : > { %2026 = vmatpush1.bf16.msra.mxu0 %v2025_v0 }
 0x1ea   : > { %1901 = vmatmul.mubr.f32.gmra.mrb[46].mxu1 %v681_v26  ;;  %2028 = vmatprep.subr.bf16.mxu0 %v2027_v5 }
 0x1ed   : > { %2030 = vmatpush1.bf16.msra.mxu0 %v2029_v9 }
 0x275   : > { %v1825_v13 = vpop.f32.mrb[16].mxu1 }
 0x276   : > { %v771_v15 = vpop.f32.mrb[17].mxu1  ;;  %v777_v16 = vadd.f32 %v1825_v13, %v2889_v11 }
 0x277   : > { %v772_v49 = vadd.f32 %v2889_v11, %v771_v15 }
 0x279   : > { %1367 = vxpose.xlu0.b32.start [1/16] (narrow) %v772_v49, 32 }
 0x27d   : > { %v1828_v17 = vpop.f32.mrb[18].mxu1  ;;  %1368 = vxpose.xlu0.b32.cont [2/16] (narrow) %v777_v16, 32 }
 0x27e   : > { %v781_v19 = vpop.f32.mrb[19].mxu1  ;;  %v787_v20 = vadd.f32 %v1828_v17, %v2889_v11 }
 0x27f   : > { %v782_v57 = vadd.f32 %v2889_v11, %v781_v19 }
 0x281   : > { %1369 = vxpose.xlu0.b32.cont [3/16] (narrow) %v782_v57, 32 }
 0x285   : > { %v1831_v21 = vpop.f32.mrb[20].mxu1  ;;  %1370 = vxpose.xlu0.b32.cont [4/16] (narrow) %v787_v20, 32 }
 0x286   : > { %v791_v3 = vpop.f32.mrb[21].mxu1  ;;  %v797_v24 = vadd.f32 %v1831_v21, %v2889_v11 }
 0x287   : > { %v792_v22 = vadd.f32 %v2889_v11, %v791_v3 }
 0x289   : > { %1371 = vxpose.xlu0.b32.cont [5/16] (narrow) %v792_v22, 32 }
 0x28d   : > { %v1834_v14 = vpop.f32.mrb[22].mxu1  ;;  %1372 = vxpose.xlu0.b32.cont [6/16] (narrow) %v797_v24, 32 }
 0x28e   : > { %v801_v26 = vpop.f32.mrb[23].mxu1  ;;  %v807_v60 = vadd.f32 %v1834_v14, %v2889_v11 }
 0x28f   : > { %v802_v45 = vadd.f32 %v2889_v11, %v801_v26 }
 0x291   : > { %v1837_v50 = vpop.f32.mrb[24].mxu1  ;;  %1373 = vxpose.xlu0.b32.cont [7/16] (narrow) %v802_v45, 32 }
 0x292   : > { %v811_v55 = vpop.f32.mrb[25].mxu1  ;;  %v817_v25 = vadd.f32 %v1837_v50, %v2889_v11 }
 0x293   : > { %v812_v12 = vadd.f32 %v2889_v11, %v811_v55 }
 0x295   : > { %v1840_v1 = vpop.f32.mrb[26].mxu1  ;;  %1374 = vxpose.xlu0.b32.cont [8/16] (narrow) %v807_v60, 32 }
 0x296   : > { %v821_v7 = vpop.f32.mrb[27].mxu1  ;;  %v827_v33 = vadd.f32 %v1840_v1, %v2889_v11 }
 0x297   : > { %v822_v29 = vadd.f32 %v2889_v11, %v821_v7 }
 0x299   : > { %v1843_v18 = vpop.f32.mrb[28].mxu1  ;;  %1375 = vxpose.xlu0.b32.cont [9/16] (narrow) %v812_v12, 32 }
 0x29a   : > { %v831_v23 = vpop.f32.mrb[29].mxu1  ;;  %v837_v44 = vadd.f32 %v1843_v18, %v2889_v11 }
 0x29b   : > { %v832_v39 = vadd.f32 %v2889_v11, %v831_v23 }
 0x29d   : > { %v1846_v27 = vpop.f32.mrb[30].mxu1  ;;  %1376 = vxpose.xlu0.b32.cont [10/16] (narrow) %v817_v25, 32 }
 0x29e   : > { %v841_v28 = vpop.f32.mrb[31].mxu1  ;;  %v847_v59 = vadd.f32 %v1846_v27, %v2889_v11 }
 0x29f   : > { %v842_v52 = vadd.f32 %v2889_v11, %v841_v28 }
 0x2a1   : > { %v1881_v31 = vpop.f32.mrb[32].mxu1  ;;  %1377 = vxpose.xlu0.b32.cont [11/16] (narrow) %v822_v29, 32 }
 0x2a2   : > { %v939_v32 = vpop.f32.mrb[33].mxu1  ;;  %v945_v35 = vadd.f32 %v1881_v31, %v2905_v30 }
 0x2a3   : > { %v940_v34 = vadd.f32 %v2905_v30, %v939_v32 }
 0x2a4   : > { %v1019_v40 = vmax.f32 %v945_v35, 0.0 }
 0x2a5   : > { %v1018_v36 = vmax.f32 %v940_v34, 0.0  ;;  %v1884_v37 = vpop.f32.mrb[34].mxu1  ;;  %1378 = vxpose.xlu0.b32.cont [12/16] (narrow) %v827_v33, 32 }
 0x2a6   : > { %v949_v38 = vpop.f32.mrb[35].mxu1  ;;  %v955_v46 = vadd.f32 %v1884_v37, %v2905_v30 }
 0x2a7   : > { %1143 = vmatmul.mubr.f32.vlgmr.msra.gmra.mrb[16].mxu0 %v1018_v36  ;;  %v950_v41 = vadd.f32 %v2905_v30, %v949_v38 }
 0x2a8   : > { %1148 = vmatprep.mubr.f32.mxu0 %v2471_v10  ;;  %v1021_v53 = vmax.f32 %v955_v46, 0.0 }
 0x2a9   : > { %v1887_v42 = vpop.f32.mrb[36].mxu1  ;;  %1379 = vxpose.xlu0.b32.cont [13/16] (narrow) %v832_v39, 32  ;;  %v1020_v47 = vmax.f32 %v950_v41, 0.0 }
 0x2aa   : > { %v959_v43 = vpop.f32.mrb[37].mxu1  ;;  %v965_v61 = vadd.f32 %v1887_v42, %v2905_v30 }
 0x2ab   : > { %1149 = vmatmul.mubr.f32.gmra.mrb[18].mxu0 %v1019_v40  ;;  %v960_v54 = vadd.f32 %v2905_v30, %v959_v43 }
 0x2ac   : > { %1154 = vmatprep.mubr.f32.mxu0 %v2471_v10  ;;  %v1023_v2 = vmax.f32 %v965_v61, 0.0 }
 0x2ad   : > { %v1890_v48 = vpop.f32.mrb[38].mxu1  ;;  %1380 = vxpose.xlu0.b32.cont [14/16] (narrow) %v837_v44, 32  ;;  %v1022_v62 = vmax.f32 %v960_v54, 0.0 }
 0x2ae   : > { %v969_v51 = vpop.f32.mrb[39].mxu1  ;;  %v975_v8 = vadd.f32 %v1890_v48, %v2905_v30 }
 0x2af   : > { %1155 = vmatmul.mubr.f32.gmra.mrb[20].mxu0 %v1020_v47  ;;  %v970_v4 = vadd.f32 %v2905_v30, %v969_v51 }
 0x2b0   : > { %1160 = vmatprep.mubr.f32.mxu0 %v2471_v10  ;;  %v1025_v15 = vmax.f32 %v975_v8, 0.0 }
 0x2b1   : > { %v1893_v56 = vpop.f32.mrb[40].mxu1  ;;  %1381 = vxpose.xlu0.b32.cont [15/16] (narrow) %v842_v52, 32  ;;  %v1024_v9 = vmax.f32 %v970_v4, 0.0 }
 0x2b2   : > { %v979_v58 = vpop.f32.mrb[41].mxu1  ;;  %v985_v16 = vadd.f32 %v1893_v56, %v2905_v30 }
 0x2b3   : > { %1161 = vmatmul.mubr.f32.gmra.mrb[22].mxu0 %v1021_v53  ;;  %v980_v49 = vadd.f32 %v2905_v30, %v979_v58 }
 0x2b4   : > { %1166 = vmatprep.mubr.f32.mxu0 %v2471_v10  ;;  %v1027_v19 = vmax.f32 %v985_v16, 0.0 }
 0x2b5   : > { %v1896_v63 = vpop.f32.mrb[42].mxu1  ;;  %1382 = vxpose.xlu0.b32.end [16/16] (narrow) %v847_v59, 32  ;;  %v1026_v17 = vmax.f32 %v980_v49, 0.0 }
 0x2b6   : > { %v989_v0 = vpop.f32.mrb[43].mxu1  ;;  %v995_v20 = vadd.f32 %v1896_v63, %v2905_v30 }
 0x2b7   : > { %1167 = vmatmul.mubr.f32.gmra.mrb[24].mxu0 %v1022_v62  ;;  %v990_v57 = vadd.f32 %v2905_v30, %v989_v0 }
 0x2b8   : > { %1172 = vmatprep.mubr.f32.mxu0 %v2471_v10  ;;  %v1029_v3 = vmax.f32 %v995_v20, 0.0 }
 0x2b9   : > { %v1899_v5 = vpop.f32.mrb[44].mxu1  ;;  %v1028_v21 = vmax.f32 %v990_v57, 0.0 }
 0x2ba   : > { %v999_v6 = vpop.f32.mrb[45].mxu1  ;;  %v1005_v24 = vadd.f32 %v1899_v5, %v2905_v30 }
 0x2bb   : > { %1173 = vmatmul.mubr.f32.gmra.mrb[26].mxu0 %v1023_v2  ;;  %v1000_v22 = vadd.f32 %v2905_v30, %v999_v6 }
 0x2bc   : > { %1178 = vmatprep.mubr.f32.mxu0 %v2471_v10  ;;  %v1031_v26 = vmax.f32 %v1005_v24, 0.0 }
 0x2bd   : > { %v1902_v11 = vpop.f32.mrb[46].mxu1  ;;  %v1030_v14 = vmax.f32 %v1000_v22, 0.0 }
 0x2be   : > { %v1009_v13 = vpop.f32.mrb[47].mxu1  ;;  %v1015_v50 = vadd.f32 %v1902_v11, %v2905_v30 }
 0x2bf   : > { %1179 = vmatmul.mubr.f32.gmra.mrb[28].mxu0 %v1024_v9  ;;  %v1010_v45 = vadd.f32 %v2905_v30, %v1009_v13 }
 0x2c0   : > { %1184 = vmatprep.mubr.f32.mxu0 %v2471_v10  ;;  %v1033_v60 = vmax.f32 %v1015_v50, 0.0 }
 0x2c1   : > { %v1032_v55 = vmax.f32 %v1010_v45, 0.0 }
 0x2c3   : > { %1185 = vmatmul.mubr.f32.gmra.mrb[30].mxu0 %v1025_v15 }
 0x2c4   : > { %1190 = vmatprep.mubr.f32.mxu0 %v2471_v10 }
 0x2c7   : > { %1191 = vmatmul.mubr.f32.gmra.mrb[32].mxu0 %v1026_v17 }
 0x2c8   : > { %1196 = vmatprep.mubr.f32.mxu0 %v2471_v10 }
 0x2cb   : > { %1197 = vmatmul.mubr.f32.gmra.mrb[34].mxu0 %v1027_v19 }
 0x2cc   : > { %1202 = vmatprep.mubr.f32.mxu0 %v2471_v10 }
 0x2cf   : > { %1203 = vmatmul.mubr.f32.gmra.mrb[36].mxu0 %v1028_v21 }
 0x2d0   : > { %1208 = vmatprep.mubr.f32.mxu0 %v2471_v10 }
 0x2d3   : > { %1209 = vmatmul.mubr.f32.gmra.mrb[38].mxu0 %v1029_v3 }
 0x2d4   : > { %1214 = vmatprep.mubr.f32.mxu0 %v2471_v10 }
 0x2d7   : > { %1215 = vmatmul.mubr.f32.gmra.mrb[40].mxu0 %v1030_v14 }
 0x2d8   : > { %1220 = vmatprep.mubr.f32.mxu0 %v2471_v10 }
 0x2db   : > { %1221 = vmatmul.mubr.f32.gmra.mrb[42].mxu0 %v1031_v26 }
 0x2dc   : > { %1226 = vmatprep.mubr.f32.mxu0 %v2471_v10 }
 0x2df   : > { %1227 = vmatmul.mubr.f32.gmra.mrb[44].mxu0 %v1032_v55 }
 0x2e0   : > { %1232 = vmatprep.mubr.f32.mxu0 %v2471_v10 }
 0x2e3   : > { %1233 = vmatmul.mubr.f32.gmra.mrb[46].mxu0 %v1033_v60 }
 0x2f9   : > { %v1383_v1 = vpop.trf.xlu0 }
 0x2fa   : > { %1399 = vst [vmem:[%s440_s18] sm:$0xff] %v1383_v1 }
 0x2fd   : > { %v1384_v7 = vpop.trf.xlu0 }
 0x2fe   : > { %1400 = vst [vmem:[%s440_s18 + $0x8] sm:$0xff] %v1384_v7 }
 0x301   : > { %v1385_v12 = vpop.trf.xlu0 }
 0x302   : > { %1401 = vst [vmem:[%s440_s18 + $0x10] sm:$0xff] %v1385_v12 }
 0x305   : > { %v1386_v18 = vpop.trf.xlu0 }
 0x306   : > { %1402 = vst [vmem:[%s440_s18 + $0x18] sm:$0xff] %v1386_v18 }
 0x307   : > { %2367 = shalt.err (!%p2364_p13)
}
 0x308   : > { %s2368_s11 = scalar_lea.hbm %s2950_s26, 512  ;;  %s2372_s13 = scalar_lea.hbm %s3114_s9, 1024 }
 0x309   : > { %p2369_p9 = scmp.ne.s32.totalorder %s2950_s26, %s2368_s11  ;;  %p2373_p4 = scmp.lt.u32.totalorder %s2950_s26, %s3114_s9 }
 0x30a   : > { %p2374_p8 = scmp.lt.u32.totalorder %s2372_s13, %s2368_s11  ;;  %p2376_p10 = scmp.lt.u32.totalorder %s2368_s11, %s2950_s26 }
 0x30b   : > { %p2370_p0 = pnand %p2369_p9, %p2707_p3 }
 0x30c   : > { %p2375_p6 = por %p2374_p8, %p2373_p4 }
 0x30d   : > { %p2371_p11 = pneg %p2370_p0 }
 0x30e   : > { %p2377_p5 = por %p2376_p10, %p2375_p6 }
 0x310   : > { %p2378_p7 = pnand %p2377_p5, %p2371_p11 }
 0x312   : > { %2381 = shalt.err (!%p2378_p7)
}
 0x313   : > { %s2473_s21 = smov 128   ;;  %s2474_s30 = smov 256   ;;  %v1068_v10 = vlaneseq }
 0x314   : > { %s2475_s22 = smov 8   ;;  %s3140_s11 = sld [smem:[#allocation21_spill]] }
 0x315   : > { %2065 = dma.vmem_to_hbm [thread:$0]  (%p2707_p3), %s2945_s25, 512, %s2950_s26, %s1436_s19, %s2473_s21, %s2474_s30, %s2475_s22   ;;  %v1069_v23 = vshrl.u32 %v1068_v10, 7 }
 0x316   : > { %s2996_s25 = scalar_lea.vmem [#allocation12], %s1625_s27  ;;  %s1646_s27 = sshll.u32 %s2554_s17, 12 }
 0x317   : > { %v1070_v25 = vsub.s32 0, %v1069_v23  ;;  %v1074_v28 = vsub.s32 1, %v1069_v23  ;;  %s1470_s26 = sshll.u32 %s2996_s25, 4  ;;  %s3141_s13 = sld [smem:[#allocation22_spill]]  ;;  %s3057_s26 = int_to_ptr.vmem [resolvable:$true] %s1470_s26 }
 0x318   : > { %s1441_s17 = scalar_lea.sflag [#allocation13], %s2759_s20  ;;  %s2382_s21 = scalar_lea.vmem %s3057_s26, 4096 }
 0x319   : > { %p2383_p12 = scmp.ne.s32.totalorder %s3057_s26, %s2382_s21  ;;  %s2476_s22 = smov [#allocation12]  }
 0x31a   : > { %v1066_v27 = vld [vmem:[%s3140_s11] sm:$0x3]  ;;  %s2386_s23 = sshll.u32 %s2476_s22, 4  ;;  %s2387_s23 = int_to_ptr.vmem [resolvable:$false] %s2386_s23 }
 0x31b   : > { %v2980_v29 = vrot.slane %v1066_v27, %v1070_v25  ;;  %v2982_v30 = vrot.slane %v1066_v27, %v1074_v28  ;;  %p2384_p1 = pnand %p2383_p12, %p2707_p3  ;;  %s2388_s10 = scalar_lea.vmem %s2387_s23, 8192 }
 0x31c   : > { %p2389_p13 = scmp.lt.s32.totalorder %s3057_s26, %s2387_s23  ;;  %p2390_p9 = scmp.lt.s32.totalorder %s2388_s10, %s2382_s21 }
 0x31d   : > { %s3142_s29 = smov %s3141_s13  ;;  %s3055_s28 = scalar_lea.hbm %s3141_s13, %s1646_s27 }
 0x31e   : > { %p2385_p2 = pneg %p2384_p1  ;;  %p2391_p0 = por %p2390_p9, %p2389_p13 }
 0x320   : > { %p2392_p11 = pnand %p2391_p0, %p2385_p2 }
 0x37a   : > { %v1144_v31 = vpop.f32.mrb[16].mxu0 }
 0x37b   : > { %v1145_v32 = vadd.f32 %v1144_v31, %v2980_v29  ;;  %v1146_v33 = vpop.f32.mrb[17].mxu0 }
 0x37c   : > { %v1147_v34 = vadd.f32 %v1146_v33, %v2982_v30 }
 0x37d   : > { %v1239_v35 = vmul.f32 0.5, %v1145_v32 }
 0x37e   : > { %v1240_v36 = vmul.f32 0.5, %v1147_v34  ;;  %v1150_v37 = vpop.f32.mrb[18].mxu0 }
 0x37f   : > { %2148 = vtanh.f32 %v1239_v35  ;;  %v1151_v38 = vadd.f32 %v1150_v37, %v2980_v29  ;;  %v1152_v39 = vpop.f32.mrb[19].mxu0 }
 0x380   : > { %2150 = vtanh.f32 %v1240_v36  ;;  %v1153_v40 = vadd.f32 %v1152_v39, %v2982_v30 }
 0x381   : > { %v1241_v41 = vmul.f32 0.5, %v1151_v38 }
 0x382   : > { %v1242_v42 = vmul.f32 0.5, %v1153_v40  ;;  %v1156_v43 = vpop.f32.mrb[20].mxu0 }
 0x383   : > { %2152 = vtanh.f32 %v1241_v41  ;;  %v1157_v44 = vadd.f32 %v1156_v43, %v2980_v29  ;;  %v1158_v46 = vpop.f32.mrb[21].mxu0 }
 0x384   : > { %2154 = vtanh.f32 %v1242_v42  ;;  %v1159_v47 = vadd.f32 %v1158_v46, %v2982_v30 }
 0x385   : > { %v1243_v48 = vmul.f32 0.5, %v1157_v44 }
 0x386   : > { %v1244_v51 = vmul.f32 0.5, %v1159_v47  ;;  %v1162_v52 = vpop.f32.mrb[22].mxu0 }
 0x387   : > { %2156 = vtanh.f32 %v1243_v48  ;;  %v1163_v53 = vadd.f32 %v1162_v52, %v2980_v29  ;;  %v1164_v54 = vpop.f32.mrb[23].mxu0 }
 0x388   : > { %2158 = vtanh.f32 %v1244_v51  ;;  %v1165_v56 = vadd.f32 %v1164_v54, %v2982_v30 }
 0x389   : > { %v2149_v58 = vpop.eup %2148  ;;  %v1245_v59 = vmul.f32 0.5, %v1163_v53 }
 0x38a   : > { %v2151_v61 = vpop.eup %2150  ;;  %v1303_v62 = vadd.f32 1.0, %v2149_v58  ;;  %v1246_v63 = vmul.f32 0.5, %v1165_v56  ;;  %v1168_v0 = vpop.f32.mrb[24].mxu0 }
 0x38b   : > { %v1304_v2 = vadd.f32 1.0, %v2151_v61  ;;  %2160 = vtanh.f32 %v1245_v59  ;;  %v1169_v4 = vadd.f32 %v1168_v0, %v2980_v29  ;;  %v1170_v5 = vpop.f32.mrb[25].mxu0 }
 0x38c   : > { %v1335_v6 = vmul.f32 0.5, %v1303_v62  ;;  %2162 = vtanh.f32 %v1246_v63  ;;  %v1171_v8 = vadd.f32 %v1170_v5, %v2982_v30 }
 0x38d   : > { %v2153_v9 = vpop.eup %2152  ;;  %v1336_v11 = vmul.f32 0.5, %v1304_v2  ;;  %v1247_v13 = vmul.f32 0.5, %v1169_v4 }
 0x38e   : > { %v2155_v15 = vpop.eup %2154  ;;  %1403 = vst [vmem:[%s2996_s25] sm:$0xff] %v1335_v6  ;;  %v1305_v49 = vadd.f32 1.0, %v2153_v9  ;;  %v1248_v16 = vmul.f32 0.5, %v1171_v8  ;;  %v1174_v17 = vpop.f32.mrb[26].mxu0 }
 0x38f   : > { %1404 = vst [vmem:[%s2996_s25 + $0x8] sm:$0xff] %v1336_v11  ;;  %v1306_v19 = vadd.f32 1.0, %v2155_v15  ;;  %2164 = vtanh.f32 %v1247_v13  ;;  %v1175_v57 = vadd.f32 %v1174_v17, %v2980_v29  ;;  %v1176_v20 = vpop.f32.mrb[27].mxu0 }
 0x390   : > { %v1337_v21 = vmul.f32 0.5, %v1305_v49  ;;  %2166 = vtanh.f32 %v1248_v16  ;;  %v1177_v3 = vadd.f32 %v1176_v20, %v2982_v30 }
 0x391   : > { %v2157_v22 = vpop.eup %2156  ;;  %v1338_v24 = vmul.f32 0.5, %v1306_v19  ;;  %v1249_v14 = vmul.f32 0.5, %v1175_v57 }
 0x392   : > { %v2159_v26 = vpop.eup %2158  ;;  %1405 = vst [vmem:[%s2996_s25 + $0x10] sm:$0xff] %v1337_v21  ;;  %v1307_v45 = vadd.f32 1.0, %v2157_v22  ;;  %v1250_v50 = vmul.f32 0.5, %v1177_v3  ;;  %v1180_v55 = vpop.f32.mrb[28].mxu0 }
 0x393   : > { %1406 = vst [vmem:[%s2996_s25 + $0x18] sm:$0xff] %v1338_v24  ;;  %v1308_v60 = vadd.f32 1.0, %v2159_v26  ;;  %2168 = vtanh.f32 %v1249_v14  ;;  %v1181_v1 = vadd.f32 %v1180_v55, %v2980_v29  ;;  %v1182_v7 = vpop.f32.mrb[29].mxu0 }
 0x394   : > { %v1339_v12 = vmul.f32 0.5, %v1307_v45  ;;  %2170 = vtanh.f32 %v1250_v50  ;;  %v1183_v18 = vadd.f32 %v1182_v7, %v2982_v30 }
 0x395   : > { %v2161_v10 = vpop.eup %2160  ;;  %v1340_v23 = vmul.f32 0.5, %v1308_v60  ;;  %v1251_v25 = vmul.f32 0.5, %v1181_v1 }
 0x396   : > { %v2163_v27 = vpop.eup %2162  ;;  %1407 = vst [vmem:[%s2996_s25 + $0x20] sm:$0xff] %v1339_v12  ;;  %v1309_v28 = vadd.f32 1.0, %v2161_v10  ;;  %v1252_v31 = vmul.f32 0.5, %v1183_v18  ;;  %v1186_v32 = vpop.f32.mrb[30].mxu0 }
 0x397   : > { %1408 = vst [vmem:[%s2996_s25 + $0x28] sm:$0xff] %v1340_v23  ;;  %v1310_v33 = vadd.f32 1.0, %v2163_v27  ;;  %2172 = vtanh.f32 %v1251_v25  ;;  %v1187_v34 = vadd.f32 %v1186_v32, %v2980_v29  ;;  %v1188_v35 = vpop.f32.mrb[31].mxu0 }
 0x398   : > { %v1341_v36 = vmul.f32 0.5, %v1309_v28  ;;  %2174 = vtanh.f32 %v1252_v31  ;;  %v1189_v37 = vadd.f32 %v1188_v35, %v2982_v30 }
 0x399   : > { %v2165_v38 = vpop.eup %2164  ;;  %v1342_v39 = vmul.f32 0.5, %v1310_v33  ;;  %v1253_v40 = vmul.f32 0.5, %v1187_v34 }
 0x39a   : > { %v2167_v41 = vpop.eup %2166  ;;  %1409 = vst [vmem:[%s2996_s25 + $0x30] sm:$0xff] %v1341_v36  ;;  %v1311_v42 = vadd.f32 1.0, %v2165_v38  ;;  %v1254_v43 = vmul.f32 0.5, %v1189_v37  ;;  %v1192_v44 = vpop.f32.mrb[32].mxu0 }
 0x39b   : > { %1410 = vst [vmem:[%s2996_s25 + $0x38] sm:$0xff] %v1342_v39  ;;  %v1312_v46 = vadd.f32 1.0, %v2167_v41  ;;  %2176 = vtanh.f32 %v1253_v40  ;;  %v1193_v47 = vadd.f32 %v1192_v44, %v2980_v29  ;;  %v1194_v48 = vpop.f32.mrb[33].mxu0 }
 0x39c   : > { %v1343_v51 = vmul.f32 0.5, %v1311_v42  ;;  %2178 = vtanh.f32 %v1254_v43  ;;  %v1195_v52 = vadd.f32 %v1194_v48, %v2982_v30 }
 0x39d   : > { %v2169_v53 = vpop.eup %2168  ;;  %v1344_v54 = vmul.f32 0.5, %v1312_v46  ;;  %v1255_v56 = vmul.f32 0.5, %v1193_v47 }
 0x39e   : > { %v2171_v58 = vpop.eup %2170  ;;  %1411 = vst [vmem:[%s2996_s25 + $0x40] sm:$0xff] %v1343_v51  ;;  %v1313_v59 = vadd.f32 1.0, %v2169_v53  ;;  %v1256_v61 = vmul.f32 0.5, %v1195_v52  ;;  %v1198_v62 = vpop.f32.mrb[34].mxu0 }
 0x39f   : > { %1412 = vst [vmem:[%s2996_s25 + $0x48] sm:$0xff] %v1344_v54  ;;  %v1314_v63 = vadd.f32 1.0, %v2171_v58  ;;  %2180 = vtanh.f32 %v1255_v56  ;;  %v1199_v0 = vadd.f32 %v1198_v62, %v2980_v29  ;;  %v1200_v2 = vpop.f32.mrb[35].mxu0 }
 0x3a0   : > { %v1345_v4 = vmul.f32 0.5, %v1313_v59  ;;  %2182 = vtanh.f32 %v1256_v61  ;;  %v1201_v5 = vadd.f32 %v1200_v2, %v2982_v30 }
 0x3a1   : > { %v2173_v6 = vpop.eup %2172  ;;  %v1346_v8 = vmul.f32 0.5, %v1314_v63  ;;  %v1257_v9 = vmul.f32 0.5, %v1199_v0 }
 0x3a2   : > { %v2175_v11 = vpop.eup %2174  ;;  %1413 = vst [vmem:[%s2996_s25 + $0x50] sm:$0xff] %v1345_v4  ;;  %v1315_v13 = vadd.f32 1.0, %v2173_v6  ;;  %v1258_v15 = vmul.f32 0.5, %v1201_v5  ;;  %v1204_v49 = vpop.f32.mrb[36].mxu0 }
 0x3a3   : > { %1414 = vst [vmem:[%s2996_s25 + $0x58] sm:$0xff] %v1346_v8  ;;  %v1316_v16 = vadd.f32 1.0, %v2175_v11  ;;  %2184 = vtanh.f32 %v1257_v9  ;;  %v1205_v17 = vadd.f32 %v1204_v49, %v2980_v29  ;;  %v1206_v19 = vpop.f32.mrb[37].mxu0 }
 0x3a4   : > { %v1347_v57 = vmul.f32 0.5, %v1315_v13  ;;  %2186 = vtanh.f32 %v1258_v15  ;;  %v1207_v20 = vadd.f32 %v1206_v19, %v2982_v30 }
 0x3a5   : > { %v2177_v21 = vpop.eup %2176  ;;  %v1348_v3 = vmul.f32 0.5, %v1316_v16  ;;  %v1259_v22 = vmul.f32 0.5, %v1205_v17 }
 0x3a6   : > { %v2179_v24 = vpop.eup %2178  ;;  %1415 = vst [vmem:[%s2996_s25 + $0x60] sm:$0xff] %v1347_v57  ;;  %v1317_v14 = vadd.f32 1.0, %v2177_v21  ;;  %v1260_v26 = vmul.f32 0.5, %v1207_v20  ;;  %v1210_v45 = vpop.f32.mrb[38].mxu0 }
 0x3a7   : > { %1416 = vst [vmem:[%s2996_s25 + $0x68] sm:$0xff] %v1348_v3  ;;  %v1318_v50 = vadd.f32 1.0, %v2179_v24  ;;  %2188 = vtanh.f32 %v1259_v22  ;;  %v1211_v55 = vadd.f32 %v1210_v45, %v2980_v29  ;;  %v1212_v60 = vpop.f32.mrb[39].mxu0 }
 0x3a8   : > { %v1349_v1 = vmul.f32 0.5, %v1317_v14  ;;  %2190 = vtanh.f32 %v1260_v26  ;;  %v1213_v7 = vadd.f32 %v1212_v60, %v2982_v30 }
 0x3a9   : > { %v2181_v12 = vpop.eup %2180  ;;  %v1350_v18 = vmul.f32 0.5, %v1318_v50  ;;  %v1261_v10 = vmul.f32 0.5, %v1211_v55 }
 0x3aa   : > { %v2183_v23 = vpop.eup %2182  ;;  %1417 = vst [vmem:[%s2996_s25 + $0x70] sm:$0xff] %v1349_v1  ;;  %v1319_v25 = vadd.f32 1.0, %v2181_v12  ;;  %v1262_v27 = vmul.f32 0.5, %v1213_v7  ;;  %v1216_v28 = vpop.f32.mrb[40].mxu0 }
 0x3ab   : > { %1418 = vst [vmem:[%s2996_s25 + $0x78] sm:$0xff] %v1350_v18  ;;  %v1320_v31 = vadd.f32 1.0, %v2183_v23  ;;  %2192 = vtanh.f32 %v1261_v10  ;;  %v1217_v32 = vadd.f32 %v1216_v28, %v2980_v29  ;;  %v1218_v33 = vpop.f32.mrb[41].mxu0 }
 0x3ac   : > { %v1351_v34 = vmul.f32 0.5, %v1319_v25  ;;  %2194 = vtanh.f32 %v1262_v27  ;;  %v1219_v35 = vadd.f32 %v1218_v33, %v2982_v30 }
 0x3ad   : > { %v2185_v36 = vpop.eup %2184  ;;  %v1352_v37 = vmul.f32 0.5, %v1320_v31  ;;  %v1263_v38 = vmul.f32 0.5, %v1217_v32 }
 0x3ae   : > { %v2187_v39 = vpop.eup %2186  ;;  %1419 = vst [vmem:[%s2996_s25 + $0x80] sm:$0xff] %v1351_v34  ;;  %v1321_v40 = vadd.f32 1.0, %v2185_v36  ;;  %v1264_v41 = vmul.f32 0.5, %v1219_v35  ;;  %v1222_v42 = vpop.f32.mrb[42].mxu0 }
 0x3af   : > { %1420 = vst [vmem:[%s2996_s25 + $0x88] sm:$0xff] %v1352_v37  ;;  %v1322_v43 = vadd.f32 1.0, %v2187_v39  ;;  %2196 = vtanh.f32 %v1263_v38  ;;  %v1223_v44 = vadd.f32 %v1222_v42, %v2980_v29  ;;  %v1224_v46 = vpop.f32.mrb[43].mxu0 }
 0x3b0   : > { %v1353_v47 = vmul.f32 0.5, %v1321_v40  ;;  %2198 = vtanh.f32 %v1264_v41  ;;  %v1225_v48 = vadd.f32 %v1224_v46, %v2982_v30 }
 0x3b1   : > { %v2189_v51 = vpop.eup %2188  ;;  %v1354_v52 = vmul.f32 0.5, %v1322_v43  ;;  %v1265_v53 = vmul.f32 0.5, %v1223_v44 }
 0x3b2   : > { %v2191_v54 = vpop.eup %2190  ;;  %1421 = vst [vmem:[%s2996_s25 + $0x90] sm:$0xff] %v1353_v47  ;;  %v1323_v56 = vadd.f32 1.0, %v2189_v51  ;;  %v1266_v58 = vmul.f32 0.5, %v1225_v48  ;;  %v1228_v59 = vpop.f32.mrb[44].mxu0 }
 0x3b3   : > { %1422 = vst [vmem:[%s2996_s25 + $0x98] sm:$0xff] %v1354_v52  ;;  %v1324_v61 = vadd.f32 1.0, %v2191_v54  ;;  %2200 = vtanh.f32 %v1265_v53  ;;  %v1229_v62 = vadd.f32 %v1228_v59, %v2980_v29  ;;  %v1230_v63 = vpop.f32.mrb[45].mxu0 }
 0x3b4   : > { %v1355_v0 = vmul.f32 0.5, %v1323_v56  ;;  %2202 = vtanh.f32 %v1266_v58  ;;  %v1231_v2 = vadd.f32 %v1230_v63, %v2982_v30 }
 0x3b5   : > { %v2193_v4 = vpop.eup %2192  ;;  %v1356_v5 = vmul.f32 0.5, %v1324_v61  ;;  %v1267_v6 = vmul.f32 0.5, %v1229_v62 }
 0x3b6   : > { %v2195_v8 = vpop.eup %2194  ;;  %1423 = vst [vmem:[%s2996_s25 + $0xa0] sm:$0xff] %v1355_v0  ;;  %v1325_v9 = vadd.f32 1.0, %v2193_v4  ;;  %v1268_v11 = vmul.f32 0.5, %v1231_v2  ;;  %v1234_v13 = vpop.f32.mrb[46].mxu0 }
 0x3b7   : > { %1424 = vst [vmem:[%s2996_s25 + $0xa8] sm:$0xff] %v1356_v5  ;;  %v1326_v15 = vadd.f32 1.0, %v2195_v8  ;;  %2204 = vtanh.f32 %v1267_v6  ;;  %v1235_v49 = vadd.f32 %v1234_v13, %v2980_v29  ;;  %v1236_v16 = vpop.f32.mrb[47].mxu0 }
 0x3b8   : > { %v1357_v17 = vmul.f32 0.5, %v1325_v9  ;;  %2206 = vtanh.f32 %v1268_v11  ;;  %v1237_v19 = vadd.f32 %v1236_v16, %v2982_v30 }
 0x3b9   : > { %v2197_v57 = vpop.eup %2196  ;;  %v1358_v20 = vmul.f32 0.5, %v1326_v15  ;;  %v1269_v21 = vmul.f32 0.5, %v1235_v49 }
 0x3ba   : > { %v2199_v3 = vpop.eup %2198  ;;  %1425 = vst [vmem:[%s2996_s25 + $0xb0] sm:$0xff] %v1357_v17  ;;  %v1327_v22 = vadd.f32 1.0, %v2197_v57  ;;  %v1270_v24 = vmul.f32 0.5, %v1237_v19 }
 0x3bb   : > { %1426 = vst [vmem:[%s2996_s25 + $0xb8] sm:$0xff] %v1358_v20  ;;  %v1328_v14 = vadd.f32 1.0, %v2199_v3  ;;  %2208 = vtanh.f32 %v1269_v21 }
 0x3bc   : > { %v1359_v29 = vmul.f32 0.5, %v1327_v22  ;;  %2210 = vtanh.f32 %v1270_v24 }
 0x3bd   : > { %v2201_v26 = vpop.eup %2200  ;;  %v1360_v45 = vmul.f32 0.5, %v1328_v14 }
 0x3be   : > { %v2203_v50 = vpop.eup %2202  ;;  %1427 = vst [vmem:[%s2996_s25 + $0xc0] sm:$0xff] %v1359_v29  ;;  %v1329_v30 = vadd.f32 1.0, %v2201_v26 }
 0x3bf   : > { %1428 = vst [vmem:[%s2996_s25 + $0xc8] sm:$0xff] %v1360_v45  ;;  %v1330_v55 = vadd.f32 1.0, %v2203_v50 }
 0x3c0   : > { %v1361_v60 = vmul.f32 0.5, %v1329_v30 }
 0x3c1   : > { %v2205_v1 = vpop.eup %2204  ;;  %v1362_v7 = vmul.f32 0.5, %v1330_v55 }
 0x3c2   : > { %v2207_v12 = vpop.eup %2206  ;;  %1429 = vst [vmem:[%s2996_s25 + $0xd0] sm:$0xff] %v1361_v60  ;;  %v1331_v18 = vadd.f32 1.0, %v2205_v1 }
 0x3c3   : > { %1430 = vst [vmem:[%s2996_s25 + $0xd8] sm:$0xff] %v1362_v7  ;;  %v1332_v10 = vadd.f32 1.0, %v2207_v12 }
 0x3c4   : > { %v1363_v23 = vmul.f32 0.5, %v1331_v18 }
 0x3c5   : > { %v2209_v25 = vpop.eup %2208  ;;  %v1364_v27 = vmul.f32 0.5, %v1332_v10 }
 0x3c6   : > { %v2211_v28 = vpop.eup %2210  ;;  %1431 = vst [vmem:[%s2996_s25 + $0xe0] sm:$0xff] %v1363_v23  ;;  %v1333_v31 = vadd.f32 1.0, %v2209_v25 }
 0x3c7   : > { %1432 = vst [vmem:[%s2996_s25 + $0xe8] sm:$0xff] %v1364_v27  ;;  %v1334_v32 = vadd.f32 1.0, %v2211_v28 }
 0x3c8   : > { %v1365_v33 = vmul.f32 0.5, %v1333_v31 }
 0x3c9   : > { %v1366_v34 = vmul.f32 0.5, %v1334_v32 }
 0x3ca   : > { %1433 = vst [vmem:[%s2996_s25 + $0xf0] sm:$0xff] %v1365_v33 }
 0x3cb   : > { %1434 = vst [vmem:[%s2996_s25 + $0xf8] sm:$0xff] %v1366_v34 }
 0x3cc   : > { %2395 = shalt.err (!%p2392_p11)
}
 0x3cd   : > { %s2396_s11 = scalar_lea.hbm %s3055_s28, 4096  ;;  %s2400_s19 = scalar_lea.hbm %s3142_s29, 8192 }
 0x3ce   : > { %p2397_p4 = scmp.ne.s32.totalorder %s3055_s28, %s2396_s11  ;;  %p2401_p10 = scmp.lt.u32.totalorder %s3055_s28, %s3142_s29 }
 0x3cf   : > { %p2402_p5 = scmp.lt.u32.totalorder %s2400_s19, %s2396_s11  ;;  %p2404_p12 = scmp.lt.u32.totalorder %s2396_s11, %s3055_s28 }
 0x3d0   : > { %p2398_p8 = pnand %p2397_p4, %p2707_p3 }
 0x3d1   : > { %p2403_p7 = por %p2402_p5, %p2401_p10 }
 0x3d2   : > { %p2399_p6 = pneg %p2398_p8 }
 0x3d3   : > { %p2405_p1 = por %p2404_p12, %p2403_p7 }
 0x3d5   : > { %p2406_p2 = pnand %p2405_p1, %p2399_p6 }
 0x3d7   : > { %2409 = shalt.err (!%p2406_p2)
}
 0x3d8   : > { %s2477_s21 = smov 16  }
 0x3d9   : > { %2066 = dma.vmem_to_hbm [thread:$0]  (%p2707_p3), %s3057_s26, 4096, %s3055_s28, %s1441_s17, %s2474_s30, %s2474_s30, %s2477_s21  }
 0x3da PF: > { %s3143_s22 = sld [smem:[#allocation19_spill]]  ;;  %s3144_s23 = sld [smem:[#allocation20_spill]] }
 0x3db   : > { %p3146_p9 = scmp.ge.s32.totalorder %s2460_s16, 2 }
 0x3e0   : > { %s1485_s10 = sand.u32 1, %s3143_s22   ;;  %p3145_p13 = scmp.ne.s32.totalorder %s3144_s23, 0 }
 0x3e1   : > { %s1486_s11 = scalar_lea.sflag [#allocation4], %s1485_s10 }
 0x3e2   : > { %p2087_p0 = pnand %p3146_p9, %p3145_p13 }
 0x3e4   : > { %2439 = dma.done.wait (!%p2087_p0), %s1486_s11, 512  }
 0x3e5   : > { %2441 = vsyncadd (!%p2087_p0), %s1486_s11, 4294966784  ;;  %s1495_s25 = scalar_lea.sflag [#allocation13], %s1485_s10 }
 0x3e6   : > { %2443 = dma.done.wait (!%p2087_p0), %s1495_s25, 4096  }
 0x3e7   : > { %2445 = vsyncadd (!%p2087_p0), %s1495_s25, 4294963200  ;;  %p29_p3 = scmp.ge.s32.totalorder %s2694_s8, 4   ;;  %s3147_s13 = smov %s2452_s14 }
 0x3e8   : > { %s3148_s14 = smov %s2456_s15  ;;  %s3149_s15 = smov %s2703_s12 }
 0x3e9   : > { %s3150_s16 = smov %s2694_s8  ;;  %31 = sbr.rel (!%p29_p3) target bundleno = 12 (0xc), region = 134 }
 0x3f0   :  { %1500 = vsyncpa [#allocation3], 1 }
 0x3f1   :  { %1502 = vsyncpa [#allocation3 + $0x1], 1 }
 0x3f2   :  { %1503 = vsyncpa [#allocation6], 1 }
 0x3f3   :  { %1504 = vsyncpa [#allocation9], 1 }
 0x3f4   :  { %1505 = vsyncpa [#allocation4], 1 }
 0x3f5   :  { %1507 = vsyncpa [#allocation4 + $0x1], 1 }
 0x3f6   :  { %1508 = vsyncpa [#allocation13], 1 }
 0x3f7   :  { %1510 = vsyncpa [#allocation13 + $0x1], 1 }

</bundles_post_ra>
